<compile_context>
chip_gen: v5e
topology: v5e:2x2
jax: 0.10.0
libtpu: 0.0.40
codegen_flags: <defaults>
</compile_context>

<pallas_src>
import jax
import jax.numpy as jnp
from jax.experimental import pallas as pl
from jax.experimental.pallas import tpu as pltpu

# Module hyper-parameters (convolutionalCapsule defaults where relevant)
IN_CAPS = 2
OUT_CAPS = 4
IN_CH = 4
OUT_CH = 8
KERNEL = 5
PAD = 2
STRIDE = 1
NUM_ROUTES = 3
# nonlinearity='sqaush' (typo in source) => squash applied on every iteration.
# batch_norm=False => the BatchNorm2d branch is never taken.


def _capsule_kernel(p_ref, w_ref, v_ref):
    """Fused conv-matmul + dynamic routing for one spatial lane tile.

    p_ref: (B, KR, T)   bf16  im2col patches of both input capsules stacked
                              along rows (+ one bias row per capsule); rows
                              padded to KR (multiple of 16); lane = w*H + h.
    w_ref: (I*OC, KR)   bf16  block-diagonal conv weights (+ bias columns).
    v_ref: (B, O, C, T) f32   routed output capsules.
    """
    B = p_ref.shape[0]
    T = p_ref.shape[-1]
    I, O, C = IN_CAPS, OUT_CAPS, OUT_CH
    inv_i = 1.0 / I
    inv_b = 1.0 / B

    w = w_ref[...]

    # ---- conv: one block-diagonal matmul per batch element ----------------
    # result row r = i*O*C + o*C + c; the (I*OC, T) -> (I*O, C, T) reshape is
    # a free regrouping of 8-row sublane blocks.
    u = [jnp.dot(w, p_ref[b], preferred_element_type=jnp.float32)
         .reshape(I * O, C, T) for b in range(B)]

    # ---- dynamic routing ---------------------------------------------------
    # b_ij is shared across the batch (as in the reference); kept per input
    # capsule as (O, T) slabs so the per-i slices below stay cheap.
    b_ij = [jnp.zeros((O, T), jnp.float32) for _ in range(I)]
    v = [None] * B
    cij = None

    for it in range(NUM_ROUTES):                       # static, unrolled
        # softmax over input capsules (== F.softmax(b_ij, dim=1)).
        # At it == 0, b_ij == 0 so c_ij == 1/I exactly -> skip exp/recip.
        if it > 0:
            m = b_ij[0]
            for i in range(1, I):
                m = jnp.maximum(m, b_ij[i])
            ex = [jnp.exp(b_ij[i] - m) for i in range(I)]
            den = ex[0]
            for i in range(1, I):
                den = den + ex[i]
            inv_den = pl.reciprocal(den, approx=True)
            cij = [(ex[i] * inv_den)[:, None, :] for i in range(I)]  # (O,1,T)

        for b in range(B):
            # s_j = sum_i c_ij * u_hat   -> (O, C, T)  (full 8-sublane vregs)
            if it == 0:
                s = u[b][0:O]
                for i in range(1, I):
                    s = s + u[b][i * O:(i + 1) * O]
                s = s * inv_i
            else:
                s = cij[0] * u[b][0:O]
                for i in range(1, I):
                    s = s + cij[i] * u[b][i * O:(i + 1) * O]
            # squash on every iteration (nonlinearity='sqaush' in the source):
            #   v = s * sqrt(sq) / (1 + sq)
            sq = jnp.sum(s * s, axis=1, keepdims=True)              # (O, 1, T)
            # NOTE: like the PyTorch source, no epsilon -> NaN iff s == 0.
            scale = (sq * jax.lax.rsqrt(sq)
                     * pl.reciprocal(1.0 + sq, approx=True))
            v[b] = s * scale                                        # (O, C, T)

        if it < NUM_ROUTES - 1:
            # agreement <u_hat, v_j>; batch mean is a plain sum over the B
            # leading slabs * 1/B (no matmul / lane swizzle needed).
            for i in range(I):
                a = jnp.sum(u[0][i * O:(i + 1) * O] * v[0], axis=1)  # (O, T)
                for b in range(1, B):
                    a = a + jnp.sum(u[b][i * O:(i + 1) * O] * v[b], axis=1)
                b_ij[i] = b_ij[i] + a * inv_b

    for b in range(B):
        v_ref[b] = v[b]


def _round_up(x, m):
    return ((x + m - 1) // m) * m


def _pick_lane_tile(wh_pad, bytes_per_lane, vmem_budget=8 << 20, cap=2048):
    """Largest multiple-of-128 divisor of wh_pad within the VMEM budget.

    wh_pad is always a multiple of 128, so T = 128 is always legal -> there is
    no giant-tile fallback any more.
    """
    mem_cap = max(128, (vmem_budget // max(bytes_per_lane, 1)) // 128 * 128)
    cap = min(cap, mem_cap)
    best = 128
    t = 128
    while t <= min(cap, wh_pad):
        if wh_pad % t == 0:
            best = t
        t += 128
    # Prefer >=2 grid steps when the spatial extent allows it so the
    # ("parallel",) grid axis can shard across v7x's two TensorCores.
    if best == wh_pad and wh_pad >= 256:
        best = 128
        t = 128
        while t <= wh_pad // 2:
            if wh_pad % t == 0:
                best = t
            t += 128
    return best


def conv_capsule_forward(x, w_conv, b_conv):
    """x: (B, in_caps, in_ch, W, H) -> (B, out_caps, out_ch, W, H)."""
    B, I, Cin, W, H = x.shape
    assert I == IN_CAPS and Cin == IN_CH
    O, C, K, P = OUT_CAPS, OUT_CH, KERNEL, PAD
    OC = O * C
    WH = W * H
    WH_pad = _round_up(WH, 128)
    Kdim = Cin * K * K                       # 100
    Krows = Kdim + 1                         # + bias row per input capsule
    KR = _round_up(I * Krows, 16)            # 202 -> 208 (bf16 sublane packing)

    # ---- host glue: im2col in the kernel's (rows, spatial-lane) layout -----
    # TODO(synk): build the im2col rows inside the kernel from a halo'd x tile
    # (manual DMA + static slices) so the 25x-duplicated `patches` array is
    # never materialised in HBM (cuts HBM input traffic ~16x at large W*H).
    xp = jnp.pad(x, ((0, 0), (0, 0), (0, 0), (P, P), (P, P)))
    cols = [xp[:, :, :, kh:kh + W, kw:kw + H]            # (B, I, Cin, W, H)
            for kh in range(K) for kw in range(K)]
    patches = jnp.stack(cols, axis=3)                    # (B, I, Cin, K*K, W, H)
    patches = patches.reshape(B, I, Kdim, WH)
    patches = jnp.pad(patches, ((0, 0), (0, 0), (0, 0), (0, WH_pad - WH)))
    # Bias row is 1 even in the spatial padding, so padded lanes get u = bias
    # and the squash never hits 0/0 in the (discarded) pad lanes.
    ones = jnp.ones((B, I, 1, WH_pad), patches.dtype)
    patches = jnp.concatenate([patches, ones], axis=2)   # (B, I, Krows, WH_pad)
    patches = patches.reshape(B, I * Krows, WH_pad)
    patches = jnp.pad(patches, ((0, 0), (0, KR - I * Krows), (0, 0)))
    patches = patches.astype(jnp.bfloat16)

    # Block-diagonal weight: one (I*OC, KR) x (KR, T) matmul covers both input
    # capsules (fills the 256-deep MXU on v6e/v7x; MXU is nowhere near the
    # bottleneck on v5e, so its nominal 2x there is irrelevant).
    w_flat = jnp.concatenate(
        [w_conv.reshape(OC, Kdim), b_conv[:, None]], axis=1)        # (OC, Krows)
    w_blk = jnp.kron(jnp.eye(I, dtype=w_flat.dtype), w_flat)        # (I*OC, I*Krows)
    w_blk = jnp.pad(w_blk, ((0, 0), (0, KR - I * Krows))).astype(jnp.bfloat16)

    # ---- lane tiling: VMEM-budgeted, always a multiple-of-128 divisor ------
    bytes_per_lane = (2 * B * KR * 2            # double-buffered bf16 patches
                      + 2 * B * O * C * 4       # double-buffered f32 output
                      + 4 * B * I * O * C * 4)  # u_hat + routing temporaries
    T = _pick_lane_tile(WH_pad, bytes_per_lane)
    num_tiles = WH_pad // T

    v = pl.pallas_call(
        _capsule_kernel,
        out_shape=jax.ShapeDtypeStruct((B, O, C, WH_pad), jnp.float32),
        grid=(num_tiles,),
        in_specs=[
            pl.BlockSpec((B, KR, T), lambda t: (0, 0, t)),
            pl.BlockSpec((I * OC, KR), lambda t: (0, 0)),
        ],
        out_specs=pl.BlockSpec((B, O, C, T), lambda t: (0, 0, 0, t)),
        compiler_params=pltpu.CompilerParams(
            dimension_semantics=("parallel",),
            vmem_limit_bytes=32 * 1024 * 1024),
    )(patches, w_blk)

    # (B, O, C, WH_pad) -> (B, O, C, W, H)   (== v_j.permute(0,3,4,1,2))
    return v[..., :WH].reshape(B, O, C, W, H)


def reference_forward(x, w_conv, b_conv):
    """Pure-JAX f32 reference matching the PyTorch forward semantics."""
    B, I, Cin, W, H = x.shape
    O, C, P = OUT_CAPS, OUT_CH, PAD
    xf = x.reshape(B * I, Cin, W, H)
    u = jax.lax.conv_general_dilated(
        xf, w_conv, window_strides=(1, 1), padding=((P, P), (P, P)),
        dimension_numbers=("NCHW", "OIHW", "NCHW"),
        precision=jax.lax.Precision.HIGHEST) + b_conv[None, :, None, None]
    u = jnp.transpose(u, (0, 2, 3, 1)).reshape(B, I, W, H, O, C)
    b_ij = jnp.zeros((1, I, W, H, O), jnp.float32)
    v = None
    for it in range(NUM_ROUTES):
        c = jax.nn.softmax(b_ij, axis=1)
        c = jnp.broadcast_to(c, (B, I, W, H, O))[..., None]
        s = jnp.sum(c * u, axis=1)                              # (B, W, H, O, C)
        sq = jnp.sum(s * s, axis=-1, keepdims=True)
        v = sq * s / ((1.0 + sq) * jnp.sqrt(sq))
        if it < NUM_ROUTES - 1:
            a = jnp.einsum("biwhoc,bwhoc->biwho", u, v)
            b_ij = b_ij + jnp.mean(a, axis=0)[None]
    return jnp.transpose(v, (0, 3, 4, 1, 2))                    # (B, O, C, W, H)


if __name__ == "__main__":
    key = jax.random.PRNGKey(0)
    kx, kw, kb = jax.random.split(key, 3)

    B, W, H = 2, 8, 8
    x = jax.random.normal(kx, (B, IN_CAPS, IN_CH, W, H), jnp.float32)
    w_conv = 0.1 * jax.random.normal(
        kw, (OUT_CAPS * OUT_CH, IN_CH, KERNEL, KERNEL), jnp.float32)
    b_conv = 0.1 * jax.random.normal(kb, (OUT_CAPS * OUT_CH,), jnp.float32)

    out = jax.jit(conv_capsule_forward)(x, w_conv, b_conv)
    out = jax.block_until_ready(out)

    ref = reference_forward(x, w_conv, b_conv)
    assert out.shape == (B, OUT_CAPS, OUT_CH, W, H), out.shape
    max_err = float(jnp.max(jnp.abs(out - ref)))
    assert jnp.allclose(out, ref, rtol=3e-2, atol=3e-2), max_err

    print("KERNEL_OK")
</pallas_src>

<mosaic_0001>
module attributes {stable_mosaic.version = 11 : i64} {
  func.func @_capsule_kernel(%arg0: i32, %arg1: memref<2x208x128xbf16, #tpu.memory_space<vmem>>, %arg2: memref<64x208xbf16, #tpu.memory_space<vmem>>, %arg3: memref<2x4x8x128xf32, #tpu.memory_space<vmem>>) attributes {dimension_semantics = [#tpu.dimension_semantics<parallel>], iteration_bounds = array<i64: 1>, scalar_prefetch = 0 : i64, scratch_operands = 0 : i64, tpu.core_type = #tpu.core_type<tc>, window_params = [{transform_indices = @transform_0, window_bounds = array<i64: 2, 208, 128>}, {pipeline_mode = #tpu.pipeline_mode<synchronous>, transform_indices = @transform_1, window_bounds = array<i64: 64, 208>}, {transform_indices = @transform_2, window_bounds = array<i64: 2, 4, 8, 128>}]} {
    %c0 = arith.constant 0 : index
    %c0_0 = arith.constant 0 : index
    %0 = vector.load %arg2[%c0, %c0_0] : memref<64x208xbf16, #tpu.memory_space<vmem>>, vector<64x208xbf16>
    %c0_1 = arith.constant 0 : index
    %c0_2 = arith.constant 0 : index
    %c0_3 = arith.constant 0 : index
    %1 = vector.load %arg1[%c0_1, %c0_2, %c0_3] : memref<2x208x128xbf16, #tpu.memory_space<vmem>>, vector<1x208x128xbf16>
    %2 = vector.shape_cast %1 : vector<1x208x128xbf16> to vector<208x128xbf16>
    %cst = arith.constant dense<0.000000e+00> : vector<64x128xf32>
    %3 = tpu.matmul %0, %2, %cst {dimension_numbers = #tpu.dot_dimension_numbers<[1], [0], [0], [1], [0, 0, 1, 1], [], []>} : vector<64x208xbf16>, vector<208x128xbf16>, vector<64x128xf32> -> vector<64x128xf32>
    %4 = vector.shape_cast %3 : vector<64x128xf32> to vector<8x8x128xf32>
    %c1 = arith.constant 1 : index
    %c0_4 = arith.constant 0 : index
    %c0_5 = arith.constant 0 : index
    %5 = vector.load %arg1[%c1, %c0_4, %c0_5] : memref<2x208x128xbf16, #tpu.memory_space<vmem>>, vector<1x208x128xbf16>
    %6 = vector.shape_cast %5 : vector<1x208x128xbf16> to vector<208x128xbf16>
    %cst_6 = arith.constant dense<0.000000e+00> : vector<64x128xf32>
    %7 = tpu.matmul %0, %6, %cst_6 {dimension_numbers = #tpu.dot_dimension_numbers<[1], [0], [0], [1], [0, 0, 1, 1], [], []>} : vector<64x208xbf16>, vector<208x128xbf16>, vector<64x128xf32> -> vector<64x128xf32>
    %8 = vector.shape_cast %7 : vector<64x128xf32> to vector<8x8x128xf32>
    %cst_7 = arith.constant 0.000000e+00 : f32
    %9 = vector.broadcast %cst_7 : f32 to vector<4x128xf32>
    %cst_8 = arith.constant 0.000000e+00 : f32
    %10 = vector.broadcast %cst_8 : f32 to vector<4x128xf32>
    %11 = vector.extract_strided_slice %4 {offsets = [0, 0, 0], sizes = [4, 8, 128], strides = [1, 1, 1]} : vector<8x8x128xf32> to vector<4x8x128xf32>
    %12 = vector.extract_strided_slice %4 {offsets = [4, 0, 0], sizes = [4, 8, 128], strides = [1, 1, 1]} : vector<8x8x128xf32> to vector<4x8x128xf32>
    %13 = arith.addf %11, %12 : vector<4x8x128xf32>
    %cst_9 = arith.constant 5.000000e-01 : f32
    %14 = vector.broadcast %cst_9 : f32 to vector<4x8x128xf32>
    %15 = arith.mulf %13, %14 : vector<4x8x128xf32>
    %16 = arith.mulf %15, %15 : vector<4x8x128xf32>
    %cst_10 = arith.constant dense<0.000000e+00> : vector<4x128xf32>
    %17 = vector.multi_reduction <add>, %16, %cst_10 [1] : vector<4x8x128xf32> to vector<4x128xf32>
    %18 = vector.shape_cast %17 : vector<4x128xf32> to vector<4x1x128xf32>
    %19 = math.rsqrt %18 : vector<4x1x128xf32>
    %20 = arith.mulf %18, %19 : vector<4x1x128xf32>
    %cst_11 = arith.constant 1.000000e+00 : f32
    %21 = vector.broadcast %cst_11 : f32 to vector<4x1x128xf32>
    %22 = arith.addf %21, %18 : vector<4x1x128xf32>
    %23 = tpu.reciprocal %22 {approx = true} : vector<4x1x128xf32> -> vector<4x1x128xf32>
    %24 = arith.mulf %20, %23 : vector<4x1x128xf32>
    %25 = vector.broadcast %24 : vector<4x1x128xf32> to vector<4x8x128xf32>
    %26 = arith.mulf %15, %25 : vector<4x8x128xf32>
    %27 = vector.extract_strided_slice %8 {offsets = [0, 0, 0], sizes = [4, 8, 128], strides = [1, 1, 1]} : vector<8x8x128xf32> to vector<4x8x128xf32>
    %28 = vector.extract_strided_slice %8 {offsets = [4, 0, 0], sizes = [4, 8, 128], strides = [1, 1, 1]} : vector<8x8x128xf32> to vector<4x8x128xf32>
    %29 = arith.addf %27, %28 : vector<4x8x128xf32>
    %cst_12 = arith.constant 5.000000e-01 : f32
    %30 = vector.broadcast %cst_12 : f32 to vector<4x8x128xf32>
    %31 = arith.mulf %29, %30 : vector<4x8x128xf32>
    %32 = arith.mulf %31, %31 : vector<4x8x128xf32>
    %cst_13 = arith.constant dense<0.000000e+00> : vector<4x128xf32>
    %33 = vector.multi_reduction <add>, %32, %cst_13 [1] : vector<4x8x128xf32> to vector<4x128xf32>
    %34 = vector.shape_cast %33 : vector<4x128xf32> to vector<4x1x128xf32>
    %35 = math.rsqrt %34 : vector<4x1x128xf32>
    %36 = arith.mulf %34, %35 : vector<4x1x128xf32>
    %cst_14 = arith.constant 1.000000e+00 : f32
    %37 = vector.broadcast %cst_14 : f32 to vector<4x1x128xf32>
    %38 = arith.addf %37, %34 : vector<4x1x128xf32>
    %39 = tpu.reciprocal %38 {approx = true} : vector<4x1x128xf32> -> vector<4x1x128xf32>
    %40 = arith.mulf %36, %39 : vector<4x1x128xf32>
    %41 = vector.broadcast %40 : vector<4x1x128xf32> to vector<4x8x128xf32>
    %42 = arith.mulf %31, %41 : vector<4x8x128xf32>
    %43 = vector.extract_strided_slice %4 {offsets = [0, 0, 0], sizes = [4, 8, 128], strides = [1, 1, 1]} : vector<8x8x128xf32> to vector<4x8x128xf32>
    %44 = arith.mulf %43, %26 : vector<4x8x128xf32>
    %cst_15 = arith.constant dense<0.000000e+00> : vector<4x128xf32>
    %45 = vector.multi_reduction <add>, %44, %cst_15 [1] : vector<4x8x128xf32> to vector<4x128xf32>
    %46 = vector.extract_strided_slice %8 {offsets = [0, 0, 0], sizes = [4, 8, 128], strides = [1, 1, 1]} : vector<8x8x128xf32> to vector<4x8x128xf32>
    %47 = arith.mulf %46, %42 : vector<4x8x128xf32>
    %cst_16 = arith.constant dense<0.000000e+00> : vector<4x128xf32>
    %48 = vector.multi_reduction <add>, %47, %cst_16 [1] : vector<4x8x128xf32> to vector<4x128xf32>
    %49 = arith.addf %45, %48 : vector<4x128xf32>
    %cst_17 = arith.constant 5.000000e-01 : f32
    %50 = vector.broadcast %cst_17 : f32 to vector<4x128xf32>
    %51 = arith.mulf %49, %50 : vector<4x128xf32>
    %52 = arith.addf %9, %51 : vector<4x128xf32>
    %53 = vector.extract_strided_slice %4 {offsets = [4, 0, 0], sizes = [4, 8, 128], strides = [1, 1, 1]} : vector<8x8x128xf32> to vector<4x8x128xf32>
    %54 = arith.mulf %53, %26 : vector<4x8x128xf32>
    %cst_18 = arith.constant dense<0.000000e+00> : vector<4x128xf32>
    %55 = vector.multi_reduction <add>, %54, %cst_18 [1] : vector<4x8x128xf32> to vector<4x128xf32>
    %56 = vector.extract_strided_slice %8 {offsets = [4, 0, 0], sizes = [4, 8, 128], strides = [1, 1, 1]} : vector<8x8x128xf32> to vector<4x8x128xf32>
    %57 = arith.mulf %56, %42 : vector<4x8x128xf32>
    %cst_19 = arith.constant dense<0.000000e+00> : vector<4x128xf32>
    %58 = vector.multi_reduction <add>, %57, %cst_19 [1] : vector<4x8x128xf32> to vector<4x128xf32>
    %59 = arith.addf %55, %58 : vector<4x128xf32>
    %cst_20 = arith.constant 5.000000e-01 : f32
    %60 = vector.broadcast %cst_20 : f32 to vector<4x128xf32>
    %61 = arith.mulf %59, %60 : vector<4x128xf32>
    %62 = arith.addf %10, %61 : vector<4x128xf32>
    %63 = arith.maximumf %52, %62 : vector<4x128xf32>
    %64 = arith.subf %52, %63 : vector<4x128xf32>
    %65 = math.exp %64 : vector<4x128xf32>
    %66 = arith.subf %62, %63 : vector<4x128xf32>
    %67 = math.exp %66 : vector<4x128xf32>
    %68 = arith.addf %65, %67 : vector<4x128xf32>
    %69 = tpu.reciprocal %68 {approx = true} : vector<4x128xf32> -> vector<4x128xf32>
    %70 = arith.mulf %65, %69 : vector<4x128xf32>
    %71 = vector.shape_cast %70 : vector<4x128xf32> to vector<4x1x128xf32>
    %72 = arith.mulf %67, %69 : vector<4x128xf32>
    %73 = vector.shape_cast %72 : vector<4x128xf32> to vector<4x1x128xf32>
    %74 = vector.extract_strided_slice %4 {offsets = [0, 0, 0], sizes = [4, 8, 128], strides = [1, 1, 1]} : vector<8x8x128xf32> to vector<4x8x128xf32>
    %75 = vector.broadcast %71 : vector<4x1x128xf32> to vector<4x8x128xf32>
    %76 = arith.mulf %75, %74 : vector<4x8x128xf32>
    %77 = vector.extract_strided_slice %4 {offsets = [4, 0, 0], sizes = [4, 8, 128], strides = [1, 1, 1]} : vector<8x8x128xf32> to vector<4x8x128xf32>
    %78 = vector.broadcast %73 : vector<4x1x128xf32> to vector<4x8x128xf32>
    %79 = arith.mulf %78, %77 : vector<4x8x128xf32>
    %80 = arith.addf %76, %79 : vector<4x8x128xf32>
    %81 = arith.mulf %80, %80 : vector<4x8x128xf32>
    %cst_21 = arith.constant dense<0.000000e+00> : vector<4x128xf32>
    %82 = vector.multi_reduction <add>, %81, %cst_21 [1] : vector<4x8x128xf32> to vector<4x128xf32>
    %83 = vector.shape_cast %82 : vector<4x128xf32> to vector<4x1x128xf32>
    %84 = math.rsqrt %83 : vector<4x1x128xf32>
    %85 = arith.mulf %83, %84 : vector<4x1x128xf32>
    %cst_22 = arith.constant 1.000000e+00 : f32
    %86 = vector.broadcast %cst_22 : f32 to vector<4x1x128xf32>
    %87 = arith.addf %86, %83 : vector<4x1x128xf32>
    %88 = tpu.reciprocal %87 {approx = true} : vector<4x1x128xf32> -> vector<4x1x128xf32>
    %89 = arith.mulf %85, %88 : vector<4x1x128xf32>
    %90 = vector.broadcast %89 : vector<4x1x128xf32> to vector<4x8x128xf32>
    %91 = arith.mulf %80, %90 : vector<4x8x128xf32>
    %92 = vector.extract_strided_slice %8 {offsets = [0, 0, 0], sizes = [4, 8, 128], strides = [1, 1, 1]} : vector<8x8x128xf32> to vector<4x8x128xf32>
    %93 = vector.broadcast %71 : vector<4x1x128xf32> to vector<4x8x128xf32>
    %94 = arith.mulf %93, %92 : vector<4x8x128xf32>
    %95 = vector.extract_strided_slice %8 {offsets = [4, 0, 0], sizes = [4, 8, 128], strides = [1, 1, 1]} : vector<8x8x128xf32> to vector<4x8x128xf32>
    %96 = vector.broadcast %73 : vector<4x1x128xf32> to vector<4x8x128xf32>
    %97 = arith.mulf %96, %95 : vector<4x8x128xf32>
    %98 = arith.addf %94, %97 : vector<4x8x128xf32>
    %99 = arith.mulf %98, %98 : vector<4x8x128xf32>
    %cst_23 = arith.constant dense<0.000000e+00> : vector<4x128xf32>
    %100 = vector.multi_reduction <add>, %99, %cst_23 [1] : vector<4x8x128xf32> to vector<4x128xf32>
    %101 = vector.shape_cast %100 : vector<4x128xf32> to vector<4x1x128xf32>
    %102 = math.rsqrt %101 : vector<4x1x128xf32>
    %103 = arith.mulf %101, %102 : vector<4x1x128xf32>
    %cst_24 = arith.constant 1.000000e+00 : f32
    %104 = vector.broadcast %cst_24 : f32 to vector<4x1x128xf32>
    %105 = arith.addf %104, %101 : vector<4x1x128xf32>
    %106 = tpu.reciprocal %105 {approx = true} : vector<4x1x128xf32> -> vector<4x1x128xf32>
    %107 = arith.mulf %103, %106 : vector<4x1x128xf32>
    %108 = vector.broadcast %107 : vector<4x1x128xf32> to vector<4x8x128xf32>
    %109 = arith.mulf %98, %108 : vector<4x8x128xf32>
    %110 = vector.extract_strided_slice %4 {offsets = [0, 0, 0], sizes = [4, 8, 128], strides = [1, 1, 1]} : vector<8x8x128xf32> to vector<4x8x128xf32>
    %111 = arith.mulf %110, %91 : vector<4x8x128xf32>
    %cst_25 = arith.constant dense<0.000000e+00> : vector<4x128xf32>
    %112 = vector.multi_reduction <add>, %111, %cst_25 [1] : vector<4x8x128xf32> to vector<4x128xf32>
    %113 = vector.extract_strided_slice %8 {offsets = [0, 0, 0], sizes = [4, 8, 128], strides = [1, 1, 1]} : vector<8x8x128xf32> to vector<4x8x128xf32>
    %114 = arith.mulf %113, %109 : vector<4x8x128xf32>
    %cst_26 = arith.constant dense<0.000000e+00> : vector<4x128xf32>
    %115 = vector.multi_reduction <add>, %114, %cst_26 [1] : vector<4x8x128xf32> to vector<4x128xf32>
    %116 = arith.addf %112, %115 : vector<4x128xf32>
    %cst_27 = arith.constant 5.000000e-01 : f32
    %117 = vector.broadcast %cst_27 : f32 to vector<4x128xf32>
    %118 = arith.mulf %116, %117 : vector<4x128xf32>
    %119 = arith.addf %52, %118 : vector<4x128xf32>
    %120 = vector.extract_strided_slice %4 {offsets = [4, 0, 0], sizes = [4, 8, 128], strides = [1, 1, 1]} : vector<8x8x128xf32> to vector<4x8x128xf32>
    %121 = arith.mulf %120, %91 : vector<4x8x128xf32>
    %cst_28 = arith.constant dense<0.000000e+00> : vector<4x128xf32>
    %122 = vector.multi_reduction <add>, %121, %cst_28 [1] : vector<4x8x128xf32> to vector<4x128xf32>
    %123 = vector.extract_strided_slice %8 {offsets = [4, 0, 0], sizes = [4, 8, 128], strides = [1, 1, 1]} : vector<8x8x128xf32> to vector<4x8x128xf32>
    %124 = arith.mulf %123, %109 : vector<4x8x128xf32>
    %cst_29 = arith.constant dense<0.000000e+00> : vector<4x128xf32>
    %125 = vector.multi_reduction <add>, %124, %cst_29 [1] : vector<4x8x128xf32> to vector<4x128xf32>
    %126 = arith.addf %122, %125 : vector<4x128xf32>
    %cst_30 = arith.constant 5.000000e-01 : f32
    %127 = vector.broadcast %cst_30 : f32 to vector<4x128xf32>
    %128 = arith.mulf %126, %127 : vector<4x128xf32>
    %129 = arith.addf %62, %128 : vector<4x128xf32>
    %130 = arith.maximumf %119, %129 : vector<4x128xf32>
    %131 = arith.subf %119, %130 : vector<4x128xf32>
    %132 = math.exp %131 : vector<4x128xf32>
    %133 = arith.subf %129, %130 : vector<4x128xf32>
    %134 = math.exp %133 : vector<4x128xf32>
    %135 = arith.addf %132, %134 : vector<4x128xf32>
    %136 = tpu.reciprocal %135 {approx = true} : vector<4x128xf32> -> vector<4x128xf32>
    %137 = arith.mulf %132, %136 : vector<4x128xf32>
    %138 = vector.shape_cast %137 : vector<4x128xf32> to vector<4x1x128xf32>
    %139 = arith.mulf %134, %136 : vector<4x128xf32>
    %140 = vector.shape_cast %139 : vector<4x128xf32> to vector<4x1x128xf32>
    %141 = vector.extract_strided_slice %4 {offsets = [0, 0, 0], sizes = [4, 8, 128], strides = [1, 1, 1]} : vector<8x8x128xf32> to vector<4x8x128xf32>
    %142 = vector.broadcast %138 : vector<4x1x128xf32> to vector<4x8x128xf32>
    %143 = arith.mulf %142, %141 : vector<4x8x128xf32>
    %144 = vector.extract_strided_slice %4 {offsets = [4, 0, 0], sizes = [4, 8, 128], strides = [1, 1, 1]} : vector<8x8x128xf32> to vector<4x8x128xf32>
    %145 = vector.broadcast %140 : vector<4x1x128xf32> to vector<4x8x128xf32>
    %146 = arith.mulf %145, %144 : vector<4x8x128xf32>
    %147 = arith.addf %143, %146 : vector<4x8x128xf32>
    %148 = arith.mulf %147, %147 : vector<4x8x128xf32>
    %cst_31 = arith.constant dense<0.000000e+00> : vector<4x128xf32>
    %149 = vector.multi_reduction <add>, %148, %cst_31 [1] : vector<4x8x128xf32> to vector<4x128xf32>
    %150 = vector.shape_cast %149 : vector<4x128xf32> to vector<4x1x128xf32>
    %151 = math.rsqrt %150 : vector<4x1x128xf32>
    %152 = arith.mulf %150, %151 : vector<4x1x128xf32>
    %cst_32 = arith.constant 1.000000e+00 : f32
    %153 = vector.broadcast %cst_32 : f32 to vector<4x1x128xf32>
    %154 = arith.addf %153, %150 : vector<4x1x128xf32>
    %155 = tpu.reciprocal %154 {approx = true} : vector<4x1x128xf32> -> vector<4x1x128xf32>
    %156 = arith.mulf %152, %155 : vector<4x1x128xf32>
    %157 = vector.broadcast %156 : vector<4x1x128xf32> to vector<4x8x128xf32>
    %158 = arith.mulf %147, %157 : vector<4x8x128xf32>
    %159 = vector.extract_strided_slice %8 {offsets = [0, 0, 0], sizes = [4, 8, 128], strides = [1, 1, 1]} : vector<8x8x128xf32> to vector<4x8x128xf32>
    %160 = vector.broadcast %138 : vector<4x1x128xf32> to vector<4x8x128xf32>
    %161 = arith.mulf %160, %159 : vector<4x8x128xf32>
    %162 = vector.extract_strided_slice %8 {offsets = [4, 0, 0], sizes = [4, 8, 128], strides = [1, 1, 1]} : vector<8x8x128xf32> to vector<4x8x128xf32>
    %163 = vector.broadcast %140 : vector<4x1x128xf32> to vector<4x8x128xf32>
    %164 = arith.mulf %163, %162 : vector<4x8x128xf32>
    %165 = arith.addf %161, %164 : vector<4x8x128xf32>
    %166 = arith.mulf %165, %165 : vector<4x8x128xf32>
    %cst_33 = arith.constant dense<0.000000e+00> : vector<4x128xf32>
    %167 = vector.multi_reduction <add>, %166, %cst_33 [1] : vector<4x8x128xf32> to vector<4x128xf32>
    %168 = vector.shape_cast %167 : vector<4x128xf32> to vector<4x1x128xf32>
    %169 = math.rsqrt %168 : vector<4x1x128xf32>
    %170 = arith.mulf %168, %169 : vector<4x1x128xf32>
    %cst_34 = arith.constant 1.000000e+00 : f32
    %171 = vector.broadcast %cst_34 : f32 to vector<4x1x128xf32>
    %172 = arith.addf %171, %168 : vector<4x1x128xf32>
    %173 = tpu.reciprocal %172 {approx = true} : vector<4x1x128xf32> -> vector<4x1x128xf32>
    %174 = arith.mulf %170, %173 : vector<4x1x128xf32>
    %175 = vector.broadcast %174 : vector<4x1x128xf32> to vector<4x8x128xf32>
    %176 = arith.mulf %165, %175 : vector<4x8x128xf32>
    %c0_35 = arith.constant 0 : index
    %c0_36 = arith.constant 0 : index
    %c0_37 = arith.constant 0 : index
    %c0_38 = arith.constant 0 : index
    %177 = vector.load %arg3[%c0_35, %c0_36, %c0_37, %c0_38] : memref<2x4x8x128xf32, #tpu.memory_space<vmem>>, vector<1x4x8x128xf32>
    %178 = vector.shape_cast %177 : vector<1x4x8x128xf32> to vector<4x8x128xf32>
    %179 = vector.shape_cast %158 : vector<4x8x128xf32> to vector<1x4x8x128xf32>
    tpu.vector_store %arg3[%c0_35, %c0_36, %c0_37, %c0_38], %179 {strides = array<i32>} : memref<2x4x8x128xf32, #tpu.memory_space<vmem>>, vector<1x4x8x128xf32>,
    %c1_39 = arith.constant 1 : index
    %c0_40 = arith.constant 0 : index
    %c0_41 = arith.constant 0 : index
    %c0_42 = arith.constant 0 : index
    %180 = vector.load %arg3[%c1_39, %c0_40, %c0_41, %c0_42] : memref<2x4x8x128xf32, #tpu.memory_space<vmem>>, vector<1x4x8x128xf32>
    %181 = vector.shape_cast %180 : vector<1x4x8x128xf32> to vector<4x8x128xf32>
    %182 = vector.shape_cast %176 : vector<4x8x128xf32> to vector<1x4x8x128xf32>
    tpu.vector_store %arg3[%c1_39, %c0_40, %c0_41, %c0_42], %182 {strides = array<i32>} : memref<2x4x8x128xf32, #tpu.memory_space<vmem>>, vector<1x4x8x128xf32>,
    return
  }
  func.func @transform_0(%arg0: i32) -> (i32, i32, i32) {
    %c0_i32 = arith.constant 0 : i32
    %c0_i32_0 = arith.constant 0 : i32
    %c0_i32_1 = arith.constant 0 : i32
    return %c0_i32, %c0_i32_0, %arg0 : i32, i32, i32
  }
  func.func @transform_1(%arg0: i32) -> (i32, i32) {
    %c0_i32 = arith.constant 0 : i32
    %c0_i32_0 = arith.constant 0 : i32
    %c0_i32_1 = arith.constant 0 : i32
    return %c0_i32, %c0_i32_0 : i32, i32
  }
  func.func @transform_2(%arg0: i32) -> (i32, i32, i32, i32) {
    %c0_i32 = arith.constant 0 : i32
    %c0_i32_0 = arith.constant 0 : i32
    %c0_i32_1 = arith.constant 0 : i32
    %c0_i32_2 = arith.constant 0 : i32
    return %c0_i32, %c0_i32_0, %c0_i32_1, %arg0 : i32, i32, i32, i32
  }
}

</mosaic_0001>

<bundles_post_ra>
// kernel: conv_capsule_forward.1
= control target key start
LH: loop header
LB: loop body
LE: loop exit
PB: predicated region body
PF: predicated region fallthrough
CT: control target
= control target key end

     0   :  { %vm160_vm0 = vcmask 654336   ;;  %s2364_s0 = inlined_call_operand.vmem [shape: bf16[2,208,128], index: 0, kind: input, shape index: {}]   ;;  %s2365_s1 = inlined_call_operand.vmem [shape: bf16[64,208], index: 1, kind: input, shape index: {}]   ;;  %s2366_s2 = inlined_call_operand.vmem [shape: f32[2,4,8,128], index: 2, kind: output, shape index: {}]  }
   0x1   :  { %v1548_v0 = vld [vmem:[%s2364_s0 + $0x38] sm:$0xff]  ;;  %v1561_v1 = vld [vmem:[%s2364_s0 + $0xa0] sm:$0xff]  ;;  %v1566_v2 = vld [vmem:[%s2364_s0 + $0xc8] sm:$0xff] }
   0x2   :  { %173 = vmatpush.bf16.msra.mxu0 %v1548_v0  ;;  %336 = vmatpush.bf16.msra.mxu2 %v1561_v1  ;;  %v1547_v3 = vld [vmem:[%s2364_s0 + $0x30] sm:$0xff]  ;;  %v1560_v4 = vld [vmem:[%s2364_s0 + $0x98] sm:$0xff]  ;;  %v1553_v5 = vld [vmem:[%s2364_s0 + $0x60] sm:$0xff] }
   0x3   :  { %368 = vmatpush.bf16.msra.mxu3 %v1566_v2  ;;  %v1565_v6 = vld [vmem:[%s2364_s0 + $0xc0] sm:$0xff]  ;;  %205 = vmatpush.bf16.msra.mxu1 %v1553_v5  ;;  %v1552_v7 = vld [vmem:[%s2364_s0 + $0x58] sm:$0xff]  ;;  %v1546_v8 = vld [vmem:[%s2364_s0 + $0x28] sm:$0xff] }
   0x4   :  { %v1559_v9 = vld [vmem:[%s2364_s0 + $0x90] sm:$0xff]  ;;  %v1564_v10 = vld [vmem:[%s2364_s0 + $0xb8] sm:$0xff]  ;;  %v1545_v12 = vld [vmem:[%s2364_s0 + $0x20] sm:$0xff] }
   0x5   :  { %v1551_v11 = vld [vmem:[%s2364_s0 + $0x50] sm:$0xff]  ;;  %v1558_v13 = vld [vmem:[%s2364_s0 + $0x88] sm:$0xff]  ;;  %v1544_v16 = vld [vmem:[%s2364_s0 + $0x18] sm:$0xff] }
   0x6   :  { %174 = vmatpush.bf16.msra.mxu0 %v1547_v3  ;;  %337 = vmatpush.bf16.msra.mxu2 %v1560_v4  ;;  %v1563_v14 = vld [vmem:[%s2364_s0 + $0xb0] sm:$0xff]  ;;  %v1550_v15 = vld [vmem:[%s2364_s0 + $0x48] sm:$0xff]  ;;  %v1557_v17 = vld [vmem:[%s2364_s0 + $0x80] sm:$0xff] }
   0x7   :  { %369 = vmatpush.bf16.msra.mxu3 %v1565_v6  ;;  %206 = vmatpush.bf16.msra.mxu1 %v1552_v7  ;;  %v1562_v18 = vld [vmem:[%s2364_s0 + $0xa8] sm:$0xff]  ;;  %v1533_v19 = vld [vmem:[%s2365_s1 + $0x4] sm:$0xf]  ;;  %v1543_v22 = vld [vmem:[%s2364_s0 + $0x10] sm:$0xff] }
   0x8   :  { %v1363_v20 = vld [vmem:[%s2365_s1 + $0x8] sm:$0xf0]  ;;  %v1549_v21 = vld [vmem:[%s2364_s0 + $0x40] sm:$0xff]  ;;  %v1556_v23 = vld [vmem:[%s2364_s0 + $0x78] sm:$0xff] }
   0x9   :  { %v1366_v24 = vor.u32 %v1533_v19, %v1363_v20  ;;  %v1542_v25 = vld [vmem:[%s2364_s0 + $0x8] sm:$0xff]  ;;  %v1555_v26 = vld [vmem:[%s2364_s0 + $0x70] sm:$0xff]  ;;  %v1541_v27 = vld [vmem:[%s2364_s0] sm:$0xff] }
   0xa   :  { %175 = vmatpush.bf16.msra.mxu0 %v1546_v8  ;;  %338 = vmatpush.bf16.msra.mxu2 %v1559_v9  ;;  %v1554_v28 = vld [vmem:[%s2364_s0 + $0x68] sm:$0xff]  ;;  %v1361_v29 = vld [vmem:[%s2365_s1] sm:$0xf]  ;;  %v1535_v32 = vld [vmem:[%s2365_s1 + $0x14] sm:$0xf] }
   0xb   :  { %370 = vmatpush.bf16.msra.mxu3 %v1564_v10  ;;  %207 = vmatpush.bf16.msra.mxu1 %v1551_v11  ;;  %v1534_v30 = vld [vmem:[%s2365_s1 + $0x4] sm:$0xf0]  ;;  %v1371_v33 = vld [vmem:[%s2365_s1 + $0x18] sm:$0xf0]  ;;  %v1369_v35 = vld [vmem:[%s2365_s1 + $0x10] sm:$0xf] }
   0xc   :  { %v1362_v31 = vor.u32 %v1534_v30, %v1361_v29  ;;  %v1374_v34 = vor.u32 %v1535_v32, %v1371_v33  ;;  %v1536_v36 = vld [vmem:[%s2365_s1 + $0x14] sm:$0xf0]  ;;  %v1537_v38 = vld [vmem:[%s2365_s1 + $0x24] sm:$0xf]  ;;  %v1379_v39 = vld [vmem:[%s2365_s1 + $0x28] sm:$0xf0] }
   0xd   :  { %v1370_v37 = vor.u32 %v1536_v36, %v1369_v35  ;;  %v1382_v40 = vor.u32 %v1537_v38, %v1379_v39  ;;  %v1377_v41 = vld [vmem:[%s2365_s1 + $0x20] sm:$0xf]  ;;  %v1538_v42 = vld [vmem:[%s2365_s1 + $0x24] sm:$0xf0]  ;;  %v1539_v44 = vld [vmem:[%s2365_s1 + $0x34] sm:$0xf] }
   0xe   :  { %176 = vmatpush.bf16.msra.mxu0 %v1545_v12  ;;  %339 = vmatpush.bf16.msra.mxu2 %v1558_v13  ;;  %v1378_v43 = vor.u32 %v1538_v42, %v1377_v41  ;;  %v1387_v45 = vld [vmem:[%s2365_s1 + $0x38] sm:$0xf0]  ;;  %v1385_v47 = vld [vmem:[%s2365_s1 + $0x30] sm:$0xf]  ;;  %v1540_v48 = vld [vmem:[%s2365_s1 + $0x34] sm:$0xf0] }
   0xf   :  { %371 = vmatpush.bf16.msra.mxu3 %v1563_v14  ;;  %208 = vmatpush.bf16.msra.mxu1 %v1550_v15  ;;  %v1390_v46 = vor.u32 %v1539_v44, %v1387_v45  ;;  %v1386_v49 = vor.u32 %v1540_v48, %v1385_v47 }
  0x12   :  { %177 = vmatpush.bf16.msra.mxu0 %v1544_v16  ;;  %340 = vmatpush.bf16.msra.mxu2 %v1557_v17 }
  0x13   :  { %372 = vmatpush.bf16.msra.mxu3 %v1562_v18  ;;  %209 = vmatpush.bf16.msra.mxu1 %v1549_v21 }
  0x16   :  { %178 = vmatpush.bf16.msra.mxu0 %v1543_v22  ;;  %341 = vmatpush.bf16.msra.mxu2 %v1556_v23 }
  0x17   :  { %1525 = vmatmul.msk.bf16.vlgmr.msra.gmra.mxu3 %vm160_vm0, %v1366_v24  ;;  %1443 = vmatmul.msk.bf16.vlgmr.msra.gmra.mxu1 %vm160_vm0, %v1366_v24 }
  0x1a   :  { %179 = vmatpush.bf16.msra.mxu0 %v1542_v25  ;;  %342 = vmatpush.bf16.msra.mxu2 %v1555_v26 }
  0x1e   :  { %180 = vmatpush.bf16.msra.mxu0 %v1541_v27  ;;  %343 = vmatpush.bf16.msra.mxu2 %v1554_v28 }
  0x21   :  { %181 = vmatmul.bf16.vlgmr.msra.gmra.mxu0 %v1362_v31  ;;  %344 = vmatmul.bf16.vlgmr.msra.gmra.mxu2 %v1362_v31 }
  0x27   :  { %1526 = vmatmul.msk.bf16.gmra.mxu3 %vm160_vm0, %v1374_v34  ;;  %1444 = vmatmul.msk.bf16.gmra.mxu1 %vm160_vm0, %v1374_v34 }
  0x31   :  { %186 = vmatmul.bf16.gmra.mxu0 %v1370_v37  ;;  %349 = vmatmul.bf16.gmra.mxu2 %v1370_v37 }
  0x37   :  { %1527 = vmatmul.msk.bf16.gmra.mxu3 %vm160_vm0, %v1382_v40  ;;  %1445 = vmatmul.msk.bf16.gmra.mxu1 %vm160_vm0, %v1382_v40 }
  0x41   :  { %191 = vmatmul.bf16.gmra.mxu0 %v1378_v43  ;;  %354 = vmatmul.bf16.gmra.mxu2 %v1378_v43 }
  0x47   :  { %1528 = vmatmul.msk.bf16.gmra.mxu3 %vm160_vm0, %v1390_v46  ;;  %1446 = vmatmul.msk.bf16.gmra.mxu1 %vm160_vm0, %v1390_v46 }
  0x51   :  { %196 = vmatmul.bf16.gmra.mxu0 %v1386_v49  ;;  %359 = vmatmul.bf16.gmra.mxu2 %v1386_v49 }
  0x94   :  { %v211_v50 = vpop.f32.mrf.mxu1 }
  0x9a   :  { %v374_v51 = vpop.f32.mrf.mxu3 }
  0x9c   :  { %v213_v52 = vpop.f32.mrf.mxu1 }
  0x9e   :  { %v182_v53 = vpop.f32.mrf.mxu0 }
  0x9f   :  { %v1864_v6 = vadd.f32 %v211_v50, %v182_v53 }
  0xa2   :  { %v376_v54 = vpop.f32.mrf.mxu3 }
  0xa4   :  { %v345_v55 = vpop.f32.mrf.mxu2  ;;  %v216_v56 = vpop.f32.mrf.mxu1 }
  0xa5   :  { %v1872_v13 = vadd.f32 %v374_v51, %v345_v55 }
  0xa6   :  { %v184_v57 = vpop.f32.mrf.mxu0 }
  0xa7   :  { %v1878_v17 = vadd.f32 %v213_v52, %v184_v57 }
  0xaa   :  { %v379_v59 = vpop.f32.mrf.mxu3 }
  0xac   :  { %v347_v58 = vpop.f32.mrf.mxu2  ;;  %v218_v61 = vpop.f32.mrf.mxu1 }
  0xad   :  { %v1892_v28 = vadd.f32 %v376_v54, %v347_v58 }
  0xae   :  { %v187_v60 = vpop.f32.mrf.mxu0 }
  0xaf   :  { %v1900_v40 = vadd.f32 %v216_v56, %v187_v60 }
  0xb2   :  { %v381_v63 = vpop.f32.mrf.mxu3 }
  0xb4   :  { %v350_v62 = vpop.f32.mrf.mxu2  ;;  %v221_v2 = vpop.f32.mrf.mxu1 }
  0xb5   :  { %v1915_v53 = vadd.f32 %v379_v59, %v350_v62 }
  0xb6   :  { %v189_v0 = vpop.f32.mrf.mxu0 }
  0xb7   :  { %v1860_v1 = vadd.f32 %v218_v61, %v189_v0 }
  0xba   :  { %v384_v8 = vpop.f32.mrf.mxu3 }
  0xbc   :  { %v352_v3 = vpop.f32.mrf.mxu2  ;;  %v223_v11 = vpop.f32.mrf.mxu1 }
  0xbd   :  { %v1862_v4 = vadd.f32 %v381_v63, %v352_v3 }
  0xbe   :  { %v192_v5 = vpop.f32.mrf.mxu0 }
  0xbf   :  { %v1866_v7 = vadd.f32 %v221_v2, %v192_v5 }
  0xc1   :  { %v394_v9 = vadd.f32 %v1866_v7, %v1864_v6 }
  0xc2   :  { %v386_v24 = vpop.f32.mrf.mxu3 }
  0xc3   :  { %v1870_v10 = vmul.f32 0.5, %v394_v9 }
  0xc4   :  { %v355_v12 = vpop.f32.mrf.mxu2  ;;  %v226_v33 = vpop.f32.mrf.mxu1 }
  0xc5   :  { %v402_v14 = vmul.f32 %v1870_v10, %v1870_v10  ;;  %v1876_v15 = vadd.f32 %v384_v8, %v355_v12 }
  0xc6   :  { %v194_v16 = vpop.f32.mrf.mxu0 }
  0xc7   :  { %v406_v18 = vrot.slane %v402_v14, 4  ;;  %v490_v19 = vadd.f32 %v1876_v15, %v1872_v13  ;;  %v1882_v20 = vadd.f32 %v223_v11, %v194_v16 }
  0xc9   :  { %v407_v21 = vadd.f32 %v406_v18, %v402_v14  ;;  %v1884_v22 = vmul.f32 0.5, %v490_v19  ;;  %v395_v23 = vadd.f32 %v1882_v20, %v1878_v17 }
  0xca   :  { %v389_v50 = vpop.f32.mrf.mxu3 }
  0xcb   :  { %v408_v25 = vrot.slane %v407_v21, 2  ;;  %v498_v26 = vmul.f32 %v1884_v22, %v1884_v22  ;;  %v1890_v27 = vmul.f32 0.5, %v395_v23 }
  0xcc   :  { %v357_v29 = vpop.f32.mrf.mxu2  ;;  %v228_v61 = vpop.f32.mrf.mxu1 }
  0xcd   :  { %v409_v30 = vadd.f32 %v408_v25, %v407_v21  ;;  %v502_v31 = vrot.slane %v498_v26, 4  ;;  %v403_v32 = vmul.f32 %v1890_v27, %v1890_v27  ;;  %v1896_v34 = vadd.f32 %v386_v24, %v357_v29 }
  0xce   :  { %v197_v35 = vpop.f32.mrf.mxu0 }
  0xcf   :  { %v410_v36 = vrot.slane %v409_v30, 1  ;;  %v503_v37 = vadd.f32 %v502_v31, %v498_v26  ;;  %v412_v38 = vrot.slane %v403_v32, 4  ;;  %v491_v39 = vadd.f32 %v1896_v34, %v1892_v28 }
  0xd0   :  { %v1902_v41 = vadd.f32 %v226_v33, %v197_v35 }
  0xd1   :  { %v1904_v42 = vadd.f32 %v410_v36, %v409_v30  ;;  %v504_v43 = vrot.slane %v503_v37, 2  ;;  %v413_v44 = vadd.f32 %v412_v38, %v403_v32  ;;  %v1906_v45 = vmul.f32 0.5, %v491_v39 }
  0xd2   :  { %v396_v46 = vadd.f32 %v1902_v41, %v1900_v40  ;;  %v391_v39 = vpop.f32.mrf.mxu3 }
  0xd3   :  { %1567 = vrsqrt.f32 %v1904_v42  ;;  %v505_v47 = vadd.f32 %v504_v43, %v503_v37  ;;  %v414_v48 = vrot.slane %v413_v44, 2  ;;  %v499_v49 = vmul.f32 %v1906_v45, %v1906_v45 }
  0xd4   :  { %v1913_v51 = vmul.f32 0.5, %v396_v46  ;;  %v360_v52 = vpop.f32.mrf.mxu2  ;;  %v474_v21 = vadd.f32 1.0, %v1904_v42  ;;  %vm436_vm1 = vweird.f32 %v1904_v42 }
  0xd5   :  { %v506_v54 = vrot.slane %v505_v47, 1  ;;  %v1917_v55 = vadd.f32 %v389_v50, %v360_v52  ;;  %v415_v56 = vadd.f32 %v414_v48, %v413_v44  ;;  %v508_v57 = vrot.slane %v499_v49, 4 }
  0xd6   :  { %v404_v58 = vmul.f32 %v1913_v51, %v1913_v51  ;;  %v199_v0 = vpop.f32.mrf.mxu0 }
  0xd7   :  { %v1921_v60 = vadd.f32 %v506_v54, %v505_v47  ;;  %v492_v63 = vadd.f32 %v1917_v55, %v1915_v53  ;;  %v416_v2 = vrot.slane %v415_v56, 1  ;;  %v509_v3 = vadd.f32 %v508_v57, %v499_v49 }
  0xd8   :  { %v418_v5 = vrot.slane %v404_v58, 4  ;;  %v1925_v59 = vadd.f32 %v228_v61, %v199_v0 }
  0xd9   :  { %v1568_v62 = vpop.eup %1567  ;;  %1569 = vrsqrt.f32 %v1921_v60  ;;  %v1928_v8 = vmul.f32 0.5, %v492_v63  ;;  %v1931_v11 = vadd.f32 %v416_v2, %v415_v56  ;;  %v510_v12 = vrot.slane %v509_v3, 2 }
  0xda   :  { %v431_v9 = vmul.f32 %v1568_v62, %v1904_v42  ;;  %v419_v14 = vadd.f32 %v418_v5, %v404_v58  ;;  %v397_v18 = vadd.f32 %v1925_v59, %v1860_v1  ;;  %v570_v29 = vadd.f32 1.0, %v1921_v60 }
  0xdb   :  { %v500_v16 = vmul.f32 %v1928_v8, %v1928_v8  ;;  %1571 = vrsqrt.f32 %v1931_v11  ;;  %v511_v23 = vadd.f32 %v510_v12, %v509_v3  ;;  %vm437_vm2 = vweird.f32 %v1568_v62 }
  0xdc   :  { %v432_v19 = vmul.f32 %v1568_v62, %v431_v9  ;;  %v420_v24 = vrot.slane %v419_v14, 2  ;;  %v1940_v30 = vmul.f32 0.5, %v397_v18  ;;  %v362_v31 = vpop.f32.mrf.mxu2  ;;  %1573 = vrcp.f32 %v474_v21  ;;  %vm438_vm3 = vmor %vm436_vm1, %vm437_vm2 }
  0xdd   :  { %v514_v25 = vrot.slane %v500_v16, 4  ;;  %v512_v33 = vrot.slane %v511_v23, 1  ;;  %v1946_v47 = vadd.f32 %v391_v39, %v362_v31  ;;  %1575 = vrcp.f32 %v570_v29 }
  0xde   :  { %v433_v26 = vmul.f32 0.5, %v432_v19  ;;  %v421_v35 = vadd.f32 %v420_v24, %v419_v14  ;;  %v405_v52 = vmul.f32 %v1940_v30, %v1940_v30  ;;  %vm532_vm4 = vweird.f32 %v1921_v60 }
  0xdf   :  { %v1570_v32 = vpop.eup %1569  ;;  %v515_v36 = vadd.f32 %v514_v25, %v500_v16  ;;  %v1944_v43 = vadd.f32 %v512_v33, %v511_v23  ;;  %v475_v58 = vadd.f32 1.0, %v1931_v11  ;;  %v493_v3 = vadd.f32 %v1946_v47, %v1862_v4 }
  0xe0   :  { %v434_v37 = vsub.f32 1.5, %v433_v26  ;;  %v527_v38 = vmul.f32 %v1570_v32, %v1921_v60  ;;  %v422_v44 = vrot.slane %v421_v35, 1  ;;  %vm533_vm5 = vweird.f32 %v1570_v32 }
  0xe1   :  { %v516_v46 = vrot.slane %v515_v36, 2  ;;  %v1572_v48 = vpop.eup %1571  ;;  %1577 = vrsqrt.f32 %v1944_v43  ;;  %v571_v12 = vadd.f32 1.0, %v1944_v43  ;;  %v424_v14 = vrot.slane %v405_v52, 4  ;;  %vm534_vm7 = vmor %vm532_vm4, %vm533_vm5 }
  0xe2   :  { %v435_v49 = vmul.f32 %v1568_v62, %v434_v37  ;;  %v528_v50 = vmul.f32 %v1570_v32, %v527_v38  ;;  %v441_v54 = vmul.f32 %v1572_v48, %v1931_v11  ;;  %v1956_v61 = vadd.f32 %v422_v44, %v421_v35  ;;  %v1574_v5 = vpop.eup %1573 }
  0xe3   :  { %v517_v2 = vadd.f32 %v516_v46, %v515_v36  ;;  %vm446_vm6 = vweird.f32 %v1931_v11  ;;  %v1576_v18 = vpop.eup %1575  ;;  %vm447_vm8 = vweird.f32 %v1572_v48  ;;  %v1970_v26 = vmul.f32 0.5, %v493_v3 }
  0xe4   :  { %v439_v56 = vsel %vm438_vm3, %v1568_v62, %v435_v49  ;;  %v529_v57 = vmul.f32 0.5, %v528_v50  ;;  %v442_v0 = vmul.f32 %v1572_v48, %v441_v54  ;;  %1579 = vrsqrt.f32 %v1956_v61  ;;  %vm448_vm9 = vmor %vm446_vm6, %vm447_vm8 }
  0xe5   :  { %v470_v63 = vmul.f32 %v439_v56, %v1904_v42  ;;  %1581 = vrcp.f32 %v475_v58  ;;  %v476_v42 = vadd.f32 1.0, %v1956_v61  ;;  %v518_v21 = vrot.slane %v517_v2, 1 }
  0xe6   :  { %v530_v9 = vsub.f32 1.5, %v529_v57  ;;  %v443_v62 = vmul.f32 0.5, %v442_v0  ;;  %1583 = vrcp.f32 %v571_v12  ;;  %v425_v33 = vadd.f32 %v424_v14, %v405_v52 }
  0xe7   :  { %v482_v16 = vmul.f32 %v1574_v5, %v470_v63  ;;  %v1965_v23 = vpop.eup %1577  ;;  %vm542_vm10 = vweird.f32 %v1944_v43  ;;  %1585 = vrcp.f32 %v476_v42  ;;  %vm456_vm14 = vweird.f32 %v1956_v61 }
  0xe8   :  { %v531_v19 = vmul.f32 %v1570_v32, %v530_v9  ;;  %v444_v25 = vsub.f32 1.5, %v443_v62  ;;  %v537_v31 = vmul.f32 %v1965_v23, %v1944_v43  ;;  %v426_v57 = vrot.slane %v425_v33, 2 }
  0xe9   :  { %v486_v24 = vmul.f32 %v482_v16, %v1870_v10  ;;  %vm543_vm11 = vweird.f32 %v1965_v23 }
  0xea   :  { %v535_v29 = vsel %vm534_vm7, %v1570_v32, %v531_v19  ;;  %v445_v10 = vmul.f32 %v1572_v48, %v444_v25  ;;  %v538_v38 = vmul.f32 %v1965_v23, %v537_v31  ;;  %v1981_v32 = vadd.f32 %v518_v21, %v517_v2  ;;  %v1580_v39 = vpop.eup %1579  ;;  %vm544_vm13 = vmor %vm542_vm10, %vm543_vm11 }
  0xeb   :  { %v586_v35 = vmul.f32 %v486_v24, %v1864_v6  ;;  %v654_v36 = vmul.f32 %v486_v24, %v1866_v7  ;;  %v566_v37 = vmul.f32 %v535_v29, %v1921_v60  ;;  %v1582_v52 = vpop.eup %1581  ;;  %v451_v56 = vmul.f32 %v1580_v39, %v1956_v61 }
  0xec   :  { %v449_v50 = vsel %vm448_vm9, %v1572_v48, %v445_v10  ;;  %v539_v60 = vmul.f32 0.5, %v538_v38  ;;  %v1584_v2 = vpop.eup %1583  ;;  %1587 = vrsqrt.f32 %v1981_v32  ;;  %vm457_vm12 = vweird.f32 %v1580_v39 }
  0xed   :  { %v590_v44 = vrot.slane %v586_v35, 4  ;;  %v658_v46 = vrot.slane %v654_v36, 4  ;;  %v578_v49 = vmul.f32 %v1576_v18, %v566_v37  ;;  %v471_v54 = vmul.f32 %v449_v50, %v1931_v11  ;;  %v1586_v16 = vpop.eup %1585  ;;  %vm458_vm15 = vmor %vm456_vm14, %vm457_vm12 }
  0xee   :  { %v540_v5 = vsub.f32 1.5, %v539_v60  ;;  %v452_v9 = vmul.f32 %v1580_v39, %v451_v56  ;;  %v427_v37 = vadd.f32 %v426_v57, %v425_v33  ;;  %vm552_vm1 = vweird.f32 %v1981_v32 }
  0xef   :  { %v591_v58 = vadd.f32 %v590_v44, %v586_v35  ;;  %v659_v63 = vadd.f32 %v658_v46, %v654_v36  ;;  %v582_v0 = vmul.f32 %v578_v49, %v1884_v22  ;;  %v483_v3 = vmul.f32 %v1582_v52, %v471_v54 }
  0xf0   :  { %v541_v18 = vmul.f32 %v1965_v23, %v540_v5  ;;  %v453_v22 = vmul.f32 0.5, %v452_v9 }
  0xf1   :  { %v592_v48 = vrot.slane %v591_v58, 2  ;;  %v660_v12 = vrot.slane %v659_v63, 2  ;;  %v614_v11 = vmul.f32 %v582_v0, %v1872_v13  ;;  %v682_v14 = vmul.f32 %v582_v0, %v1876_v15 }
  0xf2   :  { %v487_v62 = vmul.f32 %v483_v3, %v1890_v27  ;;  %v545_v31 = vsel %vm544_vm13, %v1965_v23, %v541_v18  ;;  %v454_v27 = vsub.f32 1.5, %v453_v22  ;;  %v2000_v10 = vpop.eup %1587 }
  0xf3   :  { %v593_v19 = vadd.f32 %v592_v48, %v591_v58  ;;  %v661_v42 = vadd.f32 %v660_v12, %v659_v63  ;;  %v618_v21 = vrot.slane %v614_v11, 4  ;;  %v686_v24 = vrot.slane %v682_v14, 4 }
  0xf4   :  { %v587_v25 = vmul.f32 %v487_v62, %v1878_v17  ;;  %v655_v29 = vmul.f32 %v487_v62, %v1882_v20  ;;  %v567_v46 = vmul.f32 %v545_v31, %v1944_v43  ;;  %v455_v49 = vmul.f32 %v1580_v39, %v454_v27 }
  0xf5   :  { %v619_v35 = vadd.f32 %v618_v21, %v614_v11  ;;  %v687_v36 = vadd.f32 %v686_v24, %v682_v14  ;;  %v594_v50 = vrot.slane %v593_v19, 1  ;;  %v662_v52 = vrot.slane %v661_v42, 1 }
  0xf6   :  { %v596_v38 = vrot.slane %v587_v25, 4  ;;  %v664_v44 = vrot.slane %v655_v29, 4  ;;  %v579_v58 = vmul.f32 %v1584_v2, %v567_v46  ;;  %v459_v63 = vsel %vm458_vm15, %v1580_v39, %v455_v49 }
  0xf7   :  { %v620_v54 = vrot.slane %v619_v35, 2  ;;  %v688_v60 = vrot.slane %v687_v36, 2  ;;  %v472_v33 = vmul.f32 %v459_v63, %v1956_v61  ;;  %v547_v57 = vmul.f32 %v2000_v10, %v1981_v32 }
  0xf8   :  { %v597_v23 = vadd.f32 %v596_v38, %v587_v25  ;;  %v665_v56 = vadd.f32 %v664_v44, %v655_v29  ;;  %v583_v9 = vmul.f32 %v579_v58, %v1906_v45  ;;  %v428_v48 = vrot.slane %v427_v37, 1 }
  0xf9   :  { %v621_v0 = vadd.f32 %v620_v54, %v619_v35  ;;  %v689_v3 = vadd.f32 %v688_v60, %v687_v36  ;;  %v484_v14 = vmul.f32 %v1586_v16, %v472_v33  ;;  %v548_v62 = vmul.f32 %v2000_v10, %v547_v57 }
  0xfa   :  { %v598_v5 = vrot.slane %v597_v23, 2  ;;  %v666_v43 = vrot.slane %v665_v56, 2  ;;  %v595_v18 = vadd.f32 %v594_v50, %v593_v19  ;;  %v663_v2 = vadd.f32 %v662_v52, %v661_v42 }
  0xfb   :  { %v622_v12 = vrot.slane %v621_v0, 1  ;;  %v690_v11 = vrot.slane %v689_v3, 1  ;;  %v615_v39 = vmul.f32 %v583_v9, %v1892_v28  ;;  %v683_v22 = vmul.f32 %v583_v9, %v1896_v34 }
  0xfc   :  { %v599_v24 = vadd.f32 %v598_v5, %v597_v23  ;;  %v488_v25 = vmul.f32 %v484_v14, %v1913_v51  ;;  %v549_v45 = vmul.f32 0.5, %v548_v62  ;;  %v2012_v27 = vadd.f32 %v428_v48, %v427_v37 }
  0xfd   :  { %v623_v61 = vadd.f32 %v622_v12, %v621_v0  ;;  %v691_v21 = vadd.f32 %v690_v11, %v689_v3  ;;  %v624_v29 = vrot.slane %v615_v39, 4  ;;  %v692_v31 = vrot.slane %v683_v22, 4 }
  0xfe   :  { %v667_v36 = vadd.f32 %v666_v43, %v665_v56  ;;  %v572_v19 = vadd.f32 1.0, %v1981_v32  ;;  %vm553_vm0 = vweird.f32 %v2000_v10  ;;  %v501_v44 = vmul.f32 %v1970_v26, %v1970_v26 }
  0xff   :  { %v642_v35 = vadd.f32 %v623_v61, %v595_v18  ;;  %v710_v16 = vadd.f32 %v691_v21, %v663_v2  ;;  %v625_v42 = vadd.f32 %v624_v29, %v615_v39  ;;  %v693_v38 = vadd.f32 %v692_v31, %v683_v22  ;;  %vm554_vm2 = vmor %vm552_vm1, %vm553_vm0 }
 0x100   :  { %v600_v49 = vrot.slane %v599_v24, 1  ;;  %v588_v37 = vmul.f32 %v488_v25, %v1900_v40  ;;  %v550_v54 = vsub.f32 1.5, %v549_v45  ;;  %1589 = vrsqrt.f32 %v2012_v27 }
 0x101   :  { %v2018_v46 = vmul.f32 0.5, %v642_v35  ;;  %v2020_v51 = vmul.f32 0.5, %v710_v16  ;;  %v626_v50 = vrot.slane %v625_v42, 2  ;;  %v694_v52 = vrot.slane %v693_v38, 2 }
 0x102   :  { %v668_v23 = vrot.slane %v667_v36, 1  ;;  %v656_v56 = vmul.f32 %v488_v25, %v1902_v41  ;;  %1591 = vrcp.f32 %v572_v19  ;;  %v551_v0 = vmul.f32 %v2000_v10, %v550_v54 }
 0x103   :  { %v722_v60 = vmax.f32 %v2018_v46, %v2020_v51  ;;  %v627_v58 = vadd.f32 %v626_v50, %v625_v42  ;;  %v695_v63 = vadd.f32 %v694_v52, %v693_v38  ;;  %v602_v57 = vrot.slane %v588_v37, 4 }
 0x104   :  { %v601_v5 = vadd.f32 %v600_v49, %v599_v24  ;;  %v555_v48 = vsel %vm554_vm2, %v2000_v10, %v551_v0  ;;  %v669_v14 = vadd.f32 %v668_v23, %v667_v36  ;;  %v670_v62 = vrot.slane %v656_v56, 4 }
 0x105   :  { %v726_v3 = vsub.f32 %v2018_v46, %v722_v60  ;;  %v738_v33 = vsub.f32 %v2020_v51, %v722_v60  ;;  %v628_v43 = vrot.slane %v627_v58, 1  ;;  %v696_v9 = vrot.slane %v695_v63, 1 }
 0x106   :  { %v1590_v18 = vpop.eup %1589  ;;  %v568_v22 = vmul.f32 %v555_v48, %v1981_v32  ;;  %v520_v61 = vrot.slane %v501_v44, 4  ;;  %v603_v25 = vadd.f32 %v602_v57, %v588_v37  ;;  %v671_v10 = vadd.f32 %v670_v62, %v656_v56 }
 0x107   :  { %v730_v12 = vmul.f32 1.442695, %v726_v3  ;;  %v742_v11 = vmul.f32 1.442695, %v738_v33  ;;  %v629_v2 = vadd.f32 %v628_v43, %v627_v58  ;;  %v697_v39 = vadd.f32 %v696_v9, %v695_v63 }
 0x108   :  { %v1592_v21 = vpop.eup %1591  ;;  %v461_v29 = vmul.f32 %v1590_v18, %v2012_v27  ;;  %v477_v16 = vadd.f32 1.0, %v2012_v27  ;;  %v521_v42 = vadd.f32 %v520_v61, %v501_v44  ;;  %v604_v38 = vrot.slane %v603_v25, 2 }
 0x109   :  { %1593 = vpow2.f32 %v730_v12  ;;  %v643_v24 = vadd.f32 %v629_v2, %v601_v5  ;;  %v711_v31 = vadd.f32 %v697_v39, %v669_v14  ;;  %v580_v45 = vmul.f32 %v1592_v21, %v568_v22 }
 0x10a   :  { %1595 = vpow2.f32 %v742_v11  ;;  %v462_v35 = vmul.f32 %v1590_v18, %v461_v29  ;;  %vm466_vm3 = vweird.f32 %v2012_v27  ;;  %v522_v54 = vrot.slane %v521_v42, 2 }
 0x10b   :  { %v2037_v36 = vmul.f32 0.5, %v643_v24  ;;  %v2039_v19 = vmul.f32 0.5, %v711_v31  ;;  %v584_v32 = vmul.f32 %v580_v45, %v1928_v8  ;;  %v672_v23 = vrot.slane %v671_v10, 2 }
 0x10c   :  { %v463_v49 = vmul.f32 0.5, %v462_v35  ;;  %vm467_vm4 = vweird.f32 %v1590_v18  ;;  %1597 = vrcp.f32 %v477_v16  ;;  %v605_v33 = vadd.f32 %v604_v38, %v603_v25 }
 0x10d   :  { %v723_v37 = vmax.f32 %v2037_v36, %v2039_v19  ;;  %v616_v50 = vmul.f32 %v584_v32, %v1915_v53  ;;  %v684_v52 = vmul.f32 %v584_v32, %v1917_v55  ;;  %v523_v5 = vadd.f32 %v522_v54, %v521_v42  ;;  %vm468_vm5 = vmor %vm466_vm3, %vm467_vm4 }
 0x10e   :  { %v464_v56 = vsub.f32 1.5, %v463_v49  ;;  %v673_v11 = vadd.f32 %v672_v23, %v671_v10  ;;  %v606_v24 = vrot.slane %v605_v33, 1 }
 0x10f   :  { %v1594_v60 = vpop.eup %1593  ;;  %v727_v8 = vsub.f32 %v2037_v36, %v723_v37  ;;  %v739_v44 = vsub.f32 %v2039_v19, %v723_v37  ;;  %v630_v63 = vrot.slane %v616_v50, 4  ;;  %v698_v0 = vrot.slane %v684_v52, 4 }
 0x110   :  { %v1596_v58 = vpop.eup %1595  ;;  %v465_v57 = vmul.f32 %v1590_v18, %v464_v56  ;;  %v524_v62 = vrot.slane %v523_v5, 1  ;;  %v674_v31 = vrot.slane %v673_v11, 1  ;;  %v607_v37 = vadd.f32 %v606_v24, %v605_v33 }
 0x111   :  { %v750_v3 = vadd.f32 %v1596_v58, %v1594_v60  ;;  %v732_v43 = vmul.f32 1.442695, %v727_v8  ;;  %v744_v9 = vmul.f32 1.442695, %v739_v44  ;;  %v631_v48 = vadd.f32 %v630_v63, %v616_v50 }
 0x112   :  { %v699_v12 = vadd.f32 %v698_v0, %v684_v52  ;;  %v469_v14 = vsel %vm468_vm5, %v1590_v18, %v465_v57  ;;  %v1598_v61 = vpop.eup %1597  ;;  %v2053_v21 = vadd.f32 %v524_v62, %v523_v5  ;;  %v675_v50 = vadd.f32 %v674_v31, %v673_v11 }
 0x113   :  { %1599 = vrcp.f32 %v750_v3  ;;  %v632_v2 = vrot.slane %v631_v48, 2  ;;  %v473_v22 = vmul.f32 %v469_v14, %v2012_v27 }
 0x114   :  { %1601 = vpow2.f32 %v732_v43  ;;  %v700_v39 = vrot.slane %v699_v12, 2  ;;  %vm562_vm7 = vweird.f32 %v2053_v21 }
 0x115   :  { %1603 = vpow2.f32 %v744_v9  ;;  %v633_v25 = vadd.f32 %v632_v2, %v631_v48  ;;  %v485_v45 = vmul.f32 %v1598_v61, %v473_v22 }
 0x116   :  { %v701_v29 = vadd.f32 %v700_v39, %v699_v12  ;;  %1605 = vrsqrt.f32 %v2053_v21  ;;  %v573_v12 = vadd.f32 1.0, %v2053_v21 }
 0x117   :  { %v634_v35 = vrot.slane %v633_v25, 1  ;;  %v489_v52 = vmul.f32 %v485_v45, %v1940_v30 }
 0x118   :  { %v702_v10 = vrot.slane %v701_v29, 1 }
 0x119   :  { %v1600_v18 = vpop.eup %1599  ;;  %v635_v38 = vadd.f32 %v634_v35, %v633_v25  ;;  %v589_v5 = vmul.f32 %v489_v52, %v1860_v1  ;;  %v657_v14 = vmul.f32 %v489_v52, %v1925_v59 }
 0x11a   :  { %v1602_v16 = vpop.eup %1601  ;;  %v758_v32 = vmul.f32 %v1600_v18, %v1594_v60  ;;  %v762_v42 = vmul.f32 %v1600_v18, %v1596_v58  ;;  %v703_v49 = vadd.f32 %v702_v10, %v701_v29 }
 0x11b   :  { %v1604_v27 = vpop.eup %1603  ;;  %v644_v0 = vadd.f32 %v635_v38, %v607_v37  ;;  %v608_v25 = vrot.slane %v589_v5, 4  ;;  %v676_v18 = vrot.slane %v657_v14, 4 }
 0x11c   :  { %v766_v54 = vmul.f32 %v758_v32, %v1864_v6  ;;  %v770_v23 = vmul.f32 %v762_v42, %v1866_v7  ;;  %v866_v56 = vmul.f32 %v758_v32, %v1872_v13  ;;  %v870_v8 = vmul.f32 %v762_v42, %v1876_v15  ;;  %v1606_v44 = vpop.eup %1605 }
 0x11d   :  { %v751_v63 = vadd.f32 %v1604_v27, %v1602_v16  ;;  %v712_v60 = vadd.f32 %v703_v49, %v675_v50  ;;  %v557_v33 = vmul.f32 %v1606_v44, %v2053_v21  ;;  %v2066_v30 = vmul.f32 0.5, %v644_v0 }
 0x11e   :  { %v2061_v58 = vadd.f32 %v770_v23, %v766_v54  ;;  %v2063_v3 = vadd.f32 %v870_v8, %v866_v56  ;;  %vm563_vm6 = vweird.f32 %v1606_v44  ;;  %v609_v37 = vadd.f32 %v608_v25, %v589_v5 }
 0x11f   :  { %1607 = vrcp.f32 %v751_v63  ;;  %v2068_v57 = vmul.f32 0.5, %v712_v60  ;;  %v558_v48 = vmul.f32 %v1606_v44, %v557_v33  ;;  %v677_v0 = vadd.f32 %v676_v18, %v657_v14  ;;  %vm564_vm8 = vmor %vm562_vm7, %vm563_vm6 }
 0x120   :  { %v778_v43 = vmul.f32 %v2061_v58, %v2061_v58  ;;  %v878_v9 = vmul.f32 %v2063_v3, %v2063_v3  ;;  %1609 = vrcp.f32 %v573_v12  ;;  %v610_v14 = vrot.slane %v609_v37, 2 }
 0x121   :  { %2368 = vst [vmem:[#allocation2_spill] sm:$0xff] %v2068_v57  ;;  %v724_v11 = vmax.f32 %v2066_v30, %v2068_v57  ;;  %v559_v39 = vmul.f32 0.5, %v558_v48 }
 0x122   :  { %v782_v62 = vrot.slane %v778_v43, 4  ;;  %v882_v2 = vrot.slane %v878_v9, 4 }
 0x123   :  { %v728_v22 = vsub.f32 %v2066_v30, %v724_v11  ;;  %v740_v61 = vsub.f32 %v2068_v57, %v724_v11  ;;  %v560_v31 = vsub.f32 1.5, %v559_v39  ;;  %v678_v39 = vrot.slane %v677_v0, 2 }
 0x124   :  { %v783_v29 = vadd.f32 %v782_v62, %v778_v43  ;;  %v883_v24 = vadd.f32 %v882_v2, %v878_v9 }
 0x125   :  { %v1608_v45 = vpop.eup %1607  ;;  %v734_v35 = vmul.f32 1.442695, %v728_v22  ;;  %v746_v10 = vmul.f32 1.442695, %v740_v61  ;;  %v561_v50 = vmul.f32 %v1606_v44, %v560_v31 }
 0x126   :  { %v784_v32 = vrot.slane %v783_v29, 2  ;;  %v884_v42 = vrot.slane %v883_v24, 2  ;;  %v759_v38 = vmul.f32 %v1608_v45, %v1602_v16  ;;  %v763_v49 = vmul.f32 %v1608_v45, %v1604_v27  ;;  %v1610_v16 = vpop.eup %1609 }
 0x127   :  { %1611 = vpow2.f32 %v734_v35  ;;  %v565_v5 = vsel %vm564_vm8, %v1606_v44, %v561_v50  ;;  %v2103_v35 = vadd.f32 %v678_v39, %v677_v0 }
 0x128   :  { %v785_v52 = vadd.f32 %v784_v32, %v783_v29  ;;  %v885_v54 = vadd.f32 %v884_v42, %v883_v24  ;;  %v767_v23 = vmul.f32 %v759_v38, %v1878_v17  ;;  %v771_v56 = vmul.f32 %v763_v49, %v1882_v20 }
 0x129   :  { %v867_v8 = vmul.f32 %v759_v38, %v1892_v28  ;;  %v871_v63 = vmul.f32 %v763_v49, %v1896_v34  ;;  %1613 = vpow2.f32 %v746_v10  ;;  %v569_v9 = vmul.f32 %v565_v5, %v2053_v21 }
 0x12a   :  { %v786_v27 = vrot.slane %v785_v52, 1  ;;  %v886_v60 = vrot.slane %v885_v54, 1  ;;  %v2087_v33 = vadd.f32 %v771_v56, %v767_v23  ;;  %v611_v29 = vadd.f32 %v610_v14, %v609_v37 }
 0x12b   :  { %v2089_v43 = vadd.f32 %v871_v63, %v867_v8  ;;  %v581_v22 = vmul.f32 %v1610_v16, %v569_v9  ;;  %v680_v8 = vrot.slane %v2103_v35, 1 }
 0x12c   :  { %v2092_v48 = vadd.f32 %v786_v27, %v785_v52  ;;  %v2094_v12 = vadd.f32 %v886_v60, %v885_v54  ;;  %v779_v11 = vmul.f32 %v2087_v33, %v2087_v33  ;;  %v612_v50 = vrot.slane %v611_v29, 1 }
 0x12d   :  { %v1612_v62 = vpop.eup %1611  ;;  %v879_v2 = vmul.f32 %v2089_v43, %v2089_v43  ;;  %v585_v24 = vmul.f32 %v581_v22, %v1970_v26 }
 0x12e   :  { %1615 = vrsqrt.f32 %v2092_v48  ;;  %v788_v21 = vrot.slane %v779_v11, 4  ;;  %v850_v49 = vadd.f32 1.0, %v2092_v48  ;;  %v950_v0 = vadd.f32 1.0, %v2094_v12 }
 0x12f   :  { %v1614_v44 = vpop.eup %1613  ;;  %1617 = vrsqrt.f32 %v2094_v12  ;;  %v888_v61 = vrot.slane %v879_v2, 4  ;;  %v617_v10 = vmul.f32 %v585_v24, %v1862_v4  ;;  %v685_v18 = vmul.f32 %v585_v24, %v1946_v47 }
 0x130   :  { %v752_v25 = vadd.f32 %v1614_v44, %v1612_v62  ;;  %v789_v31 = vadd.f32 %v788_v21, %v779_v11  ;;  %vm812_vm9 = vweird.f32 %v2092_v48  ;;  %vm912_vm10 = vweird.f32 %v2094_v12 }
 0x131   :  { %v889_v45 = vadd.f32 %v888_v61, %v879_v2  ;;  %v636_v52 = vrot.slane %v617_v10, 4  ;;  %v704_v54 = vrot.slane %v685_v18, 4 }
 0x132   :  { %1619 = vrcp.f32 %v752_v25  ;;  %v790_v32 = vrot.slane %v789_v31, 2 }
 0x133   :  { %v890_v42 = vrot.slane %v889_v45, 2  ;;  %v637_v16 = vadd.f32 %v636_v52, %v617_v10  ;;  %v705_v27 = vadd.f32 %v704_v54, %v685_v18  ;;  %1621 = vrcp.f32 %v850_v49 }
 0x134   :  { %v1616_v38 = vpop.eup %1615  ;;  %v791_v23 = vadd.f32 %v790_v32, %v789_v31  ;;  %1623 = vrcp.f32 %v950_v0 }
 0x135   :  { %v1618_v37 = vpop.eup %1617  ;;  %v807_v26 = vmul.f32 %v1616_v38, %v2092_v48  ;;  %v891_v56 = vadd.f32 %v890_v42, %v889_v45  ;;  %v638_v2 = vrot.slane %v637_v16, 2  ;;  %v706_v31 = vrot.slane %v705_v27, 2 }
 0x136   :  { %v907_v63 = vmul.f32 %v1618_v37, %v2094_v12  ;;  %v792_v5 = vrot.slane %v791_v23, 1  ;;  %vm813_vm11 = vweird.f32 %v1616_v38  ;;  %vm913_vm12 = vweird.f32 %v1618_v37 }
 0x137   :  { %v808_v60 = vmul.f32 %v1616_v38, %v807_v26  ;;  %v892_v9 = vrot.slane %v891_v56, 1  ;;  %v639_v10 = vadd.f32 %v638_v2, %v637_v16  ;;  %vm814_vm13 = vmor %vm812_vm9, %vm813_vm11  ;;  %v2134_v16 = vadd.f32 %v612_v50, %v611_v29 }
 0x138   :  { %v1620_v11 = vpop.eup %1619  ;;  %v908_v14 = vmul.f32 %v1618_v37, %v907_v63  ;;  %v2114_v22 = vadd.f32 %v792_v5, %v791_v23  ;;  %vm914_vm14 = vmor %vm912_vm10, %vm913_vm12 }
 0x139   :  { %v809_v39 = vmul.f32 0.5, %v808_v60  ;;  %v2116_v21 = vadd.f32 %v892_v9, %v891_v56  ;;  %v760_v61 = vmul.f32 %v1620_v11, %v1612_v62  ;;  %v764_v24 = vmul.f32 %v1620_v11, %v1614_v44  ;;  %v1622_v44 = vpop.eup %1621 }
 0x13a   :  { %v909_v25 = vmul.f32 0.5, %v908_v14  ;;  %1625 = vrsqrt.f32 %v2114_v22  ;;  %v851_v32 = vadd.f32 1.0, %v2114_v22  ;;  %v2128_v56 = vadd.f32 %v706_v31, %v705_v27  ;;  %v1624_v5 = vpop.eup %1623 }
 0x13b   :  { %v810_v45 = vsub.f32 1.5, %v809_v39  ;;  %1627 = vrsqrt.f32 %v2116_v21  ;;  %v951_v49 = vadd.f32 1.0, %v2116_v21  ;;  %v768_v62 = vmul.f32 %v760_v61, %v1900_v40 }
 0x13c   :  { %v910_v18 = vsub.f32 1.5, %v909_v25  ;;  %v772_v52 = vmul.f32 %v764_v24, %v1902_v41  ;;  %v868_v26 = vmul.f32 %v760_v61, %v1915_v53  ;;  %v872_v23 = vmul.f32 %v764_v24, %v1917_v55 }
 0x13d   :  { %v811_v42 = vmul.f32 %v1616_v38, %v810_v45  ;;  %v640_v60 = vrot.slane %v639_v10, 1  ;;  %1629 = vrcp.f32 %v851_v32  ;;  %v2143_v39 = vadd.f32 %v680_v8, %v2103_v35 }
 0x13e   :  { %v911_v54 = vmul.f32 %v1618_v37, %v910_v18  ;;  %v2132_v0 = vadd.f32 %v772_v52, %v768_v62  ;;  %v2137_v14 = vadd.f32 %v872_v23, %v868_v26  ;;  %1631 = vrcp.f32 %v951_v49 }
 0x13f   :  { %v815_v63 = vsel %vm814_vm13, %v1616_v38, %v811_v42  ;;  %vm822_vm15 = vweird.f32 %v2114_v22  ;;  %vm922_vm0 = vweird.f32 %v2116_v21  ;;  %v2152_v31 = vadd.f32 %v640_v60, %v639_v10 }
 0x140   :  { %v846_v9 = vmul.f32 %v815_v63, %v2092_v48  ;;  %v915_v11 = vsel %vm914_vm14, %v1618_v37, %v911_v54  ;;  %v1626_v2 = vpop.eup %1625  ;;  %v780_v38 = vmul.f32 %v2132_v0, %v2132_v0  ;;  %v880_v48 = vmul.f32 %v2137_v14, %v2137_v14 }
 0x141   :  { %v946_v27 = vmul.f32 %v915_v11, %v2094_v12  ;;  %v1628_v29 = vpop.eup %1627  ;;  %v817_v61 = vmul.f32 %v1626_v2, %v2114_v22  ;;  %v708_v37 = vrot.slane %v2128_v56, 1  ;;  %vm823_vm1 = vweird.f32 %v1626_v2 }
 0x142   :  { %v858_v50 = vmul.f32 %v1622_v44, %v846_v9  ;;  %v917_v12 = vmul.f32 %v1628_v29, %v2116_v21  ;;  %v794_v24 = vrot.slane %v780_v38, 4  ;;  %v894_v45 = vrot.slane %v880_v48, 4  ;;  %vm824_vm3 = vmor %vm822_vm15, %vm823_vm1 }
 0x143   :  { %v958_v25 = vmul.f32 %v1624_v5, %v946_v27  ;;  %v818_v8 = vmul.f32 %v1626_v2, %v817_v61  ;;  %vm923_vm2 = vweird.f32 %v1628_v29  ;;  %v1630_v49 = vpop.eup %1629 }
 0x144   :  { %v862_v35 = vmul.f32 %v858_v50, %v2061_v58  ;;  %v918_v32 = vmul.f32 %v1628_v29, %v917_v12  ;;  %v795_v42 = vadd.f32 %v794_v24, %v780_v38  ;;  %v895_v54 = vadd.f32 %v894_v45, %v880_v48  ;;  %v1632_v26 = vpop.eup %1631  ;;  %vm924_vm4 = vmor %vm922_vm0, %vm923_vm2 }
 0x145   :  { %v962_v18 = vmul.f32 %v958_v25, %v2063_v3  ;;  %v819_v44 = vmul.f32 0.5, %v818_v8 }
 0x146   :  { %v966_v62 = vmul.f32 %v862_v35, %v1864_v6  ;;  %v1034_v52 = vmul.f32 %v862_v35, %v1866_v7  ;;  %v919_v23 = vmul.f32 0.5, %v918_v32  ;;  %v796_v63 = vrot.slane %v795_v42, 2 }
 0x147   :  { %v994_v10 = vmul.f32 %v962_v18, %v1872_v13  ;;  %v1062_v58 = vmul.f32 %v962_v18, %v1876_v15  ;;  %v820_v3 = vsub.f32 1.5, %v819_v44  ;;  %v896_v9 = vrot.slane %v895_v54, 2 }
 0x148   :  { %v970_v60 = vrot.slane %v966_v62, 4  ;;  %v1038_v5 = vrot.slane %v1034_v52, 4  ;;  %v920_v38 = vsub.f32 1.5, %v919_v23  ;;  %v797_v50 = vadd.f32 %v796_v63, %v795_v42 }
 0x149   :  { %v998_v11 = vrot.slane %v994_v10, 4  ;;  %v1066_v27 = vrot.slane %v1062_v58, 4  ;;  %v821_v12 = vmul.f32 %v1626_v2, %v820_v3  ;;  %v897_v24 = vadd.f32 %v896_v9, %v895_v54 }
 0x14a   :  { %v971_v61 = vadd.f32 %v970_v60, %v966_v62  ;;  %v1039_v25 = vadd.f32 %v1038_v5, %v1034_v52  ;;  %v921_v8 = vmul.f32 %v1628_v29, %v920_v38  ;;  %v798_v45 = vrot.slane %v797_v50, 1 }
 0x14b   :  { %v999_v48 = vadd.f32 %v998_v11, %v994_v10  ;;  %v1067_v35 = vadd.f32 %v1066_v27, %v1062_v58  ;;  %v825_v44 = vsel %vm824_vm3, %v1626_v2, %v821_v12  ;;  %v898_v42 = vrot.slane %v897_v24, 1 }
 0x14c   :  { %v972_v18 = vrot.slane %v971_v61, 2  ;;  %v1040_v32 = vrot.slane %v1039_v25, 2  ;;  %v847_v54 = vmul.f32 %v825_v44, %v2114_v22  ;;  %v925_v10 = vsel %vm924_vm4, %v1628_v29, %v921_v8 }
 0x14d   :  { %v1000_v62 = vrot.slane %v999_v48, 2  ;;  %v1068_v52 = vrot.slane %v1067_v35, 2  ;;  %v947_v63 = vmul.f32 %v925_v10, %v2116_v21  ;;  %v2168_v60 = vadd.f32 %v798_v45, %v797_v50 }
 0x14e   :  { %v973_v58 = vadd.f32 %v972_v18, %v971_v61  ;;  %v1041_v23 = vadd.f32 %v1040_v32, %v1039_v25  ;;  %v859_v9 = vmul.f32 %v1630_v49, %v847_v54  ;;  %v709_v2 = vadd.f32 %v708_v37, %v2128_v56 }
 0x14f   :  { %v1001_v5 = vadd.f32 %v1000_v62, %v999_v48  ;;  %v1069_v3 = vadd.f32 %v1068_v52, %v1067_v35  ;;  %v959_v38 = vmul.f32 %v1632_v26, %v947_v63  ;;  %1633 = vrsqrt.f32 %v2168_v60 }
 0x150   :  { %v974_v11 = vrot.slane %v973_v58, 1  ;;  %v1042_v27 = vrot.slane %v1041_v23, 1  ;;  %v863_v22 = vmul.f32 %v859_v9, %v2087_v33  ;;  %v2173_v29 = vadd.f32 %v898_v42, %v897_v24 }
 0x151   :  { %v1002_v12 = vrot.slane %v1001_v5, 1  ;;  %v1070_v57 = vrot.slane %v1069_v3, 1  ;;  %v963_v50 = vmul.f32 %v959_v38, %v2089_v43  ;;  %v852_v25 = vadd.f32 1.0, %v2168_v60 }
 0x152   :  { %v975_v61 = vadd.f32 %v974_v11, %v973_v58  ;;  %v1043_v21 = vadd.f32 %v1042_v27, %v1041_v23  ;;  %v967_v56 = vmul.f32 %v863_v22, %v1878_v17  ;;  %v1035_v37 = vmul.f32 %v863_v22, %v1882_v20 }
 0x153   :  { %v1003_v49 = vadd.f32 %v1002_v12, %v1001_v5  ;;  %v1071_v48 = vadd.f32 %v1070_v57, %v1069_v3  ;;  %v995_v26 = vmul.f32 %v963_v50, %v1892_v28  ;;  %v1063_v35 = vmul.f32 %v963_v50, %v1896_v34 }
 0x154   :  { %1635 = vrcp.f32 %v852_v25  ;;  %v645_v33 = vadd.f32 %v2152_v31, %v2134_v16  ;;  %v976_v45 = vrot.slane %v967_v56, 4  ;;  %v1044_v43 = vrot.slane %v1035_v37, 4 }
 0x155   :  { %v1022_v24 = vadd.f32 %v1003_v49, %v975_v61  ;;  %v1090_v8 = vadd.f32 %v1071_v48, %v1043_v21  ;;  %v1634_v18 = vpop.eup %1633  ;;  %v1004_v32 = vrot.slane %v995_v26, 4  ;;  %v1072_v44 = vrot.slane %v1063_v35, 4 }
 0x156   :  { %1637 = vrsqrt.f32 %v2173_v29  ;;  %v713_v57 = vadd.f32 %v709_v2, %v2143_v39  ;;  %v977_v52 = vadd.f32 %v976_v45, %v967_v56  ;;  %v1045_v54 = vadd.f32 %v1044_v43, %v1035_v37 }
 0x157   :  { %v1026_v42 = vmul.f32 0.5, %v1022_v24  ;;  %v1094_v62 = vmul.f32 0.5, %v1090_v8  ;;  %v1005_v10 = vadd.f32 %v1004_v32, %v995_v26  ;;  %v1073_v58 = vadd.f32 %v1072_v44, %v1063_v35 }
 0x158   :  { %v827_v23 = vmul.f32 %v1634_v18, %v2168_v60  ;;  %vm832_vm5 = vweird.f32 %v2168_v60  ;;  %v952_v16 = vadd.f32 1.0, %v2173_v29  ;;  %v978_v5 = vrot.slane %v977_v52, 2 }
 0x159   :  { %v1030_v31 = vadd.f32 %v1026_v42, %v2018_v46  ;;  %v1098_v63 = vadd.f32 %v1094_v62, %v2020_v51  ;;  %v1046_v3 = vrot.slane %v1045_v54, 2  ;;  %v1006_v39 = vrot.slane %v1005_v10, 2 }
 0x15a   :  { %v1636_v9 = vpop.eup %1635  ;;  %v1074_v2 = vrot.slane %v1073_v58, 2  ;;  %v828_v11 = vmul.f32 %v1634_v18, %v827_v23  ;;  %vm833_vm6 = vweird.f32 %v1634_v18  ;;  %v979_v38 = vadd.f32 %v978_v5, %v977_v52 }
 0x15b   :  { %v1102_v27 = vmax.f32 %v1030_v31, %v1098_v63  ;;  %v1047_v12 = vadd.f32 %v1046_v3, %v1045_v54  ;;  %v2190_v22 = vmul.f32 0.5, %v645_v33  ;;  %v1007_v21 = vadd.f32 %v1006_v39, %v1005_v10  ;;  %vm834_vm7 = vmor %vm832_vm5, %vm833_vm6 }
 0x15c   :  { %v1638_v61 = vpop.eup %1637  ;;  %v1075_v50 = vadd.f32 %v1074_v2, %v1073_v58  ;;  %v829_v25 = vmul.f32 0.5, %v828_v11  ;;  %v2192_v49 = vmul.f32 0.5, %v713_v57  ;;  %v980_v48 = vrot.slane %v979_v38, 1 }
 0x15d   :  { %v1106_v46 = vsub.f32 %v1030_v31, %v1102_v27  ;;  %v1118_v51 = vsub.f32 %v1098_v63, %v1102_v27  ;;  %v1048_v56 = vrot.slane %v1047_v12, 1  ;;  %v1008_v37 = vrot.slane %v1007_v21, 1 }
 0x15e   :  { %v1076_v26 = vrot.slane %v1075_v50, 1  ;;  %v830_v35 = vsub.f32 1.5, %v829_v25  ;;  %v927_v24 = vmul.f32 %v1638_v61, %v2173_v29  ;;  %v981_v43 = vadd.f32 %v980_v48, %v979_v38 }
 0x15f   :  { %v1110_v8 = vmul.f32 1.442695, %v1106_v46  ;;  %v1122_v45 = vmul.f32 1.442695, %v1118_v51  ;;  %v1049_v33 = vadd.f32 %v1048_v56, %v1047_v12  ;;  %v1009_v32 = vadd.f32 %v1008_v37, %v1007_v21 }
 0x160   :  { %v1077_v44 = vadd.f32 %v1076_v26, %v1075_v50  ;;  %v831_v42 = vmul.f32 %v1634_v18, %v830_v35  ;;  %v928_v62 = vmul.f32 %v1638_v61, %v927_v24  ;;  %v725_v57 = vmax.f32 %v2190_v22, %v2192_v49 }
 0x161   :  { %1639 = vpow2.f32 %v1110_v8  ;;  %v1023_v52 = vadd.f32 %v1009_v32, %v981_v43  ;;  %vm933_vm8 = vweird.f32 %v1638_v61  ;;  %vm932_vm9 = vweird.f32 %v2173_v29 }
 0x162   :  { %1641 = vpow2.f32 %v1122_v45  ;;  %v1091_v54 = vadd.f32 %v1077_v44, %v1049_v33  ;;  %v835_v10 = vsel %vm834_vm7, %v1634_v18, %v831_v42  ;;  %v929_v23 = vmul.f32 0.5, %v928_v62  ;;  %vm934_vm10 = vmor %vm932_vm9, %vm933_vm8 }
 0x163   :  { %v848_v58 = vmul.f32 %v835_v10, %v2168_v60  ;;  %v729_v31 = vsub.f32 %v2190_v22, %v725_v57  ;;  %v741_v63 = vsub.f32 %v2192_v49, %v725_v57  ;;  %v1027_v5 = vmul.f32 0.5, %v1023_v52 }
 0x164   :  { %v1095_v3 = vmul.f32 0.5, %v1091_v54  ;;  %1643 = vrcp.f32 %v952_v16  ;;  %v930_v2 = vsub.f32 1.5, %v929_v23 }
 0x165   :  { %v860_v39 = vmul.f32 %v1636_v9, %v848_v58  ;;  %v736_v11 = vmul.f32 1.442695, %v729_v31  ;;  %v748_v27 = vmul.f32 1.442695, %v741_v63  ;;  %v1031_v38 = vadd.f32 %v1027_v5, %v2037_v36 }
 0x166   :  { %v1099_v12 = vadd.f32 %v1095_v3, %v2039_v19  ;;  %v931_v21 = vmul.f32 %v1638_v61, %v930_v2 }
 0x167   :  { %v1640_v18 = vpop.eup %1639  ;;  %v864_v60 = vmul.f32 %v860_v39, %v2132_v0  ;;  %1645 = vpow2.f32 %v736_v11 }
 0x168   :  { %v1642_v50 = vpop.eup %1641  ;;  %v1103_v25 = vmax.f32 %v1031_v38, %v1099_v12  ;;  %1647 = vpow2.f32 %v748_v27  ;;  %v935_v9 = vsel %vm934_vm10, %v1638_v61, %v931_v21 }
 0x169   :  { %v1130_v16 = vadd.f32 %v1642_v50, %v1640_v18  ;;  %v968_v46 = vmul.f32 %v864_v60, %v1900_v40  ;;  %v1036_v36 = vmul.f32 %v864_v60, %v1902_v41  ;;  %v948_v0 = vmul.f32 %v935_v9, %v2173_v29 }
 0x16a   :  { %v1644_v51 = vpop.eup %1643  ;;  %v1107_v19 = vsub.f32 %v1031_v38, %v1103_v25  ;;  %v1119_v48 = vsub.f32 %v1099_v12, %v1103_v25 }
 0x16b   :  { %1649 = vrcp.f32 %v1130_v16  ;;  %v982_v56 = vrot.slane %v968_v46, 4  ;;  %v1050_v37 = vrot.slane %v1036_v36, 4  ;;  %v960_v24 = vmul.f32 %v1644_v51, %v948_v0 }
 0x16c   :  { %v1112_v26 = vmul.f32 1.442695, %v1107_v19  ;;  %v1124_v35 = vmul.f32 1.442695, %v1119_v48 }
 0x16d   :  { %v1646_v8 = vpop.eup %1645  ;;  %v983_v45 = vadd.f32 %v982_v56, %v968_v46  ;;  %v1051_v43 = vadd.f32 %v1050_v37, %v1036_v36  ;;  %v964_v61 = vmul.f32 %v960_v24, %v2137_v14 }
 0x16e   :  { %v1648_v33 = vpop.eup %1647  ;;  %1651 = vpow2.f32 %v1112_v26 }
 0x16f   :  { %1653 = vpow2.f32 %v1124_v35  ;;  %v984_v32 = vrot.slane %v983_v45, 2  ;;  %v1052_v44 = vrot.slane %v1051_v43, 2  ;;  %v753_v42 = vadd.f32 %v1648_v33, %v1646_v8 }
 0x170   :  { %v996_v62 = vmul.f32 %v964_v61, %v1915_v53  ;;  %v1064_v29 = vmul.f32 %v964_v61, %v1917_v55 }
 0x171   :  { %v1650_v57 = vpop.eup %1649  ;;  %v985_v52 = vadd.f32 %v984_v32, %v983_v45  ;;  %v1053_v54 = vadd.f32 %v1052_v44, %v1051_v43  ;;  %1655 = vrcp.f32 %v753_v42 }
 0x172   :  { %v1138_v10 = vmul.f32 %v1650_v57, %v1640_v18  ;;  %v1142_v58 = vmul.f32 %v1650_v57, %v1642_v50  ;;  %v1010_v23 = vrot.slane %v996_v62, 4  ;;  %v1078_v31 = vrot.slane %v1064_v29, 4 }
 0x173   :  { %v986_v63 = vrot.slane %v985_v52, 1  ;;  %v1054_v38 = vrot.slane %v1053_v54, 1 }
 0x174   :  { %v1652_v5 = vpop.eup %1651  ;;  %v1146_v14 = vmul.f32 %v1138_v10, %v1864_v6  ;;  %v1150_v3 = vmul.f32 %v1142_v58, %v1866_v7  ;;  %v1246_v39 = vmul.f32 %v1138_v10, %v1872_v13  ;;  %v1250_v2 = vmul.f32 %v1142_v58, %v1876_v15 }
 0x175   :  { %v1654_v11 = vpop.eup %1653  ;;  %v1011_v27 = vadd.f32 %v1010_v23, %v996_v62  ;;  %v1079_v12 = vadd.f32 %v1078_v31, %v1064_v29  ;;  %v987_v25 = vadd.f32 %v986_v63, %v985_v52  ;;  %v1055_v46 = vadd.f32 %v1054_v38, %v1053_v54 }
 0x176   :  { %v2218_v60 = vadd.f32 %v1150_v3, %v1146_v14  ;;  %v2220_v18 = vadd.f32 %v1250_v2, %v1246_v39  ;;  %v1131_v21 = vadd.f32 %v1654_v11, %v1652_v5 }
 0x177   :  { %v1656_v50 = vpop.eup %1655  ;;  %v1012_v16 = vrot.slane %v1011_v27, 2  ;;  %v1080_v9 = vrot.slane %v1079_v12, 2 }
 0x178   :  { %v1158_v6 = vmul.f32 %v2218_v60, %v2218_v60  ;;  %v1258_v7 = vmul.f32 %v2220_v18, %v2220_v18  ;;  %1657 = vrcp.f32 %v1131_v21  ;;  %v761_v13 = vmul.f32 %v1656_v50, %v1646_v8 }
 0x179   :  { %v1013_v15 = vadd.f32 %v1012_v16, %v1011_v27  ;;  %v1081_v36 = vadd.f32 %v1080_v9, %v1079_v12  ;;  %v765_v51 = vmul.f32 %v1656_v50, %v1648_v33 }
 0x17a   :  { %v1162_v19 = vrot.slane %v1158_v6, 4  ;;  %v1262_v48 = vrot.slane %v1258_v7, 4  ;;  %v769_v0 = vmul.f32 %v761_v13, %v1860_v1  ;;  %v869_v56 = vmul.f32 %v761_v13, %v1862_v4 }
 0x17b   :  { %v1014_v37 = vrot.slane %v1013_v15, 1  ;;  %v1082_v26 = vrot.slane %v1081_v36, 1  ;;  %v773_v35 = vmul.f32 %v765_v51, %v1925_v59  ;;  %v873_v24 = vmul.f32 %v765_v51, %v1946_v47 }
 0x17c   :  { %v1163_v45 = vadd.f32 %v1162_v19, %v1158_v6  ;;  %v1263_v43 = vadd.f32 %v1262_v48, %v1258_v7 }
 0x17d   :  { %v1015_v61 = vadd.f32 %v1014_v37, %v1013_v15  ;;  %v1083_v8 = vadd.f32 %v1082_v26, %v1081_v36  ;;  %v2230_v32 = vadd.f32 %v773_v35, %v769_v0  ;;  %v2232_v44 = vadd.f32 %v873_v24, %v869_v56 }
 0x17e   :  { %v1658_v33 = vpop.eup %1657  ;;  %v1164_v42 = vrot.slane %v1163_v45, 2  ;;  %v1264_v62 = vrot.slane %v1263_v43, 2 }
 0x17f   :  { %v1139_v29 = vmul.f32 %v1658_v33, %v1652_v5  ;;  %v1143_v57 = vmul.f32 %v1658_v33, %v1654_v11  ;;  %v1024_v52 = vadd.f32 %v1015_v61, %v987_v25  ;;  %v1092_v54 = vadd.f32 %v1083_v8, %v1055_v46 }
 0x180   :  { %v1165_v10 = vadd.f32 %v1164_v42, %v1163_v45  ;;  %v1265_v58 = vadd.f32 %v1264_v62, %v1263_v43  ;;  %v781_v23 = vmul.f32 %v2230_v32, %v2230_v32  ;;  %v881_v31 = vmul.f32 %v2232_v44, %v2232_v44 }
 0x181   :  { %v1147_v63 = vmul.f32 %v1139_v29, %v1878_v17  ;;  %v1151_v14 = vmul.f32 %v1143_v57, %v1882_v20  ;;  %v1247_v3 = vmul.f32 %v1139_v29, %v1892_v28  ;;  %v1251_v39 = vmul.f32 %v1143_v57, %v1896_v34  ;;  %v2369_v20 = vld [vmem:[#allocation2_spill] sm:$0xff] }
 0x182   :  { %v1166_v5 = vrot.slane %v1165_v10, 1  ;;  %v1266_v2 = vrot.slane %v1265_v58, 1  ;;  %v1028_v11 = vmul.f32 0.5, %v1024_v52  ;;  %v1096_v27 = vmul.f32 0.5, %v1092_v54 }
 0x183   :  { %v2242_v38 = vadd.f32 %v1151_v14, %v1147_v63  ;;  %v2244_v12 = vadd.f32 %v1251_v39, %v1247_v3  ;;  %v800_v21 = vrot.slane %v781_v23, 4  ;;  %v900_v50 = vrot.slane %v881_v31, 4 }
 0x184   :  { %v2246_v25 = vadd.f32 %v1166_v5, %v1165_v10  ;;  %v2248_v16 = vadd.f32 %v1266_v2, %v1265_v58  ;;  %v1032_v17 = vadd.f32 %v1028_v11, %v2066_v30  ;;  %v1100_v28 = vadd.f32 %v1096_v27, %v2369_v20 }
 0x185   :  { %v1159_v34 = vmul.f32 %v2242_v38, %v2242_v38  ;;  %v1259_v9 = vmul.f32 %v2244_v12, %v2244_v12  ;;  %v801_v6 = vadd.f32 %v800_v21, %v781_v23  ;;  %v901_v7 = vadd.f32 %v900_v50, %v881_v31 }
 0x186   :  { %1659 = vrsqrt.f32 %v2246_v25  ;;  %v1104_v46 = vmax.f32 %v1032_v17, %v1100_v28  ;;  %v1230_v45 = vadd.f32 1.0, %v2246_v25  ;;  %v1330_v62 = vadd.f32 1.0, %v2248_v16 }
 0x187   :  { %1661 = vrsqrt.f32 %v2248_v16  ;;  %v1168_v13 = vrot.slane %v1159_v34, 4  ;;  %v1268_v15 = vrot.slane %v1259_v9, 4  ;;  %v802_v36 = vrot.slane %v801_v6, 2 }
 0x188   :  { %v902_v51 = vrot.slane %v901_v7, 2  ;;  %v1108_v48 = vsub.f32 %v1032_v17, %v1104_v46  ;;  %v1120_v0 = vsub.f32 %v1100_v28, %v1104_v46  ;;  %vm1192_vm13 = vweird.f32 %v2246_v25 }
 0x189   :  { %v1169_v30 = vadd.f32 %v1168_v13, %v1159_v34  ;;  %v1269_v19 = vadd.f32 %v1268_v15, %v1259_v9  ;;  %v803_v56 = vadd.f32 %v802_v36, %v801_v6  ;;  %vm1292_vm15 = vweird.f32 %v2248_v16 }
 0x18a   :  { %v903_v37 = vadd.f32 %v902_v51, %v901_v7  ;;  %v1114_v43 = vmul.f32 1.442695, %v1108_v48  ;;  %v1126_v61 = vmul.f32 1.442695, %v1120_v0 }
 0x18b   :  { %v1170_v26 = vrot.slane %v1169_v30, 2  ;;  %v1270_v35 = vrot.slane %v1269_v19, 2  ;;  %v804_v8 = vrot.slane %v803_v56, 1 }
 0x18c   :  { %v1660_v24 = vpop.eup %1659  ;;  %1663 = vpow2.f32 %v1114_v43  ;;  %v904_v10 = vrot.slane %v903_v37, 1 }
 0x18d   :  { %v1662_v33 = vpop.eup %1661  ;;  %v1187_v42 = vmul.f32 %v1660_v24, %v2246_v25  ;;  %v1171_v29 = vadd.f32 %v1170_v26, %v1169_v30  ;;  %v1271_v57 = vadd.f32 %v1270_v35, %v1269_v19  ;;  %v2262_v54 = vadd.f32 %v804_v8, %v803_v56 }
 0x18e   :  { %v1287_v52 = vmul.f32 %v1662_v33, %v2248_v16  ;;  %1665 = vpow2.f32 %v1126_v61  ;;  %vm1193_vm11 = vweird.f32 %v1660_v24  ;;  %v2270_v11 = vadd.f32 %v904_v10, %v903_v37 }
 0x18f   :  { %v1188_v58 = vmul.f32 %v1660_v24, %v1187_v42  ;;  %v1172_v23 = vrot.slane %v1171_v29, 1  ;;  %v1272_v31 = vrot.slane %v1271_v57, 1  ;;  %1667 = vrsqrt.f32 %v2262_v54  ;;  %vm1194_vm14 = vmor %vm1192_vm13, %vm1193_vm11 }
 0x190   :  { %v1288_v63 = vmul.f32 %v1662_v33, %v1287_v52  ;;  %1669 = vrcp.f32 %v1230_v45  ;;  %vm1293_vm12 = vweird.f32 %v1662_v33  ;;  %v853_v9 = vadd.f32 1.0, %v2262_v54 }
 0x191   :  { %v1189_v14 = vmul.f32 0.5, %v1188_v58  ;;  %v2265_v3 = vadd.f32 %v1172_v23, %v1171_v29  ;;  %v2267_v39 = vadd.f32 %v1272_v31, %v1271_v57  ;;  %1671 = vrcp.f32 %v1330_v62  ;;  %vm1294_vm0 = vmor %vm1292_vm15, %vm1293_vm12 }
 0x192   :  { %v1289_v5 = vmul.f32 0.5, %v1288_v63  ;;  %v1664_v27 = vpop.eup %1663  ;;  %vm842_vm1 = vweird.f32 %v2262_v54  ;;  %v953_v42 = vadd.f32 1.0, %v2270_v11  ;;  %vm942_vm11 = vweird.f32 %v2270_v11 }
 0x193   :  { %v1190_v2 = vsub.f32 1.5, %v1189_v14  ;;  %1673 = vrsqrt.f32 %v2265_v3  ;;  %v1231_v51 = vadd.f32 1.0, %v2265_v3  ;;  %v1331_v26 = vadd.f32 1.0, %v2267_v39 }
 0x194   :  { %v1290_v21 = vsub.f32 1.5, %v1289_v5  ;;  %1675 = vrsqrt.f32 %v2267_v39  ;;  %v1666_v50 = vpop.eup %1665  ;;  %vm1202_vm2 = vweird.f32 %v2265_v3  ;;  %vm1302_vm3 = vweird.f32 %v2267_v39 }
 0x195   :  { %v1191_v17 = vmul.f32 %v1660_v24, %v1190_v2  ;;  %v2274_v20 = vpop.eup %1667  ;;  %v1132_v34 = vadd.f32 %v1666_v50, %v1664_v27  ;;  %1677 = vrsqrt.f32 %v2270_v11 }
 0x196   :  { %v1291_v28 = vmul.f32 %v1662_v33, %v1290_v21  ;;  %v1670_v6 = vpop.eup %1669  ;;  %v837_v13 = vmul.f32 %v2274_v20, %v2262_v54  ;;  %vm843_vm4 = vweird.f32 %v2274_v20 }
 0x197   :  { %v1195_v7 = vsel %vm1194_vm14, %v1660_v24, %v1191_v17  ;;  %v1672_v15 = vpop.eup %1671  ;;  %1679 = vrcp.f32 %v1132_v34  ;;  %vm844_vm7 = vmor %vm842_vm1, %vm843_vm4 }
 0x198   :  { %v1226_v46 = vmul.f32 %v1195_v7, %v2246_v25  ;;  %v1295_v36 = vsel %vm1294_vm0, %v1662_v33, %v1291_v28  ;;  %v838_v48 = vmul.f32 %v2274_v20, %v837_v13  ;;  %1681 = vrcp.f32 %v853_v9 }
 0x199   :  { %v1674_v30 = vpop.eup %1673  ;;  %v1326_v19 = vmul.f32 %v1295_v36, %v2248_v16  ;;  %1683 = vrcp.f32 %v1231_v51 }
 0x19a   :  { %v1676_v0 = vpop.eup %1675  ;;  %v1238_v56 = vmul.f32 %v1670_v6, %v1226_v46  ;;  %v1197_v37 = vmul.f32 %v1674_v30, %v2265_v3  ;;  %v839_v24 = vmul.f32 0.5, %v838_v48  ;;  %1685 = vrcp.f32 %v1331_v26 }
 0x19b   :  { %v1338_v35 = vmul.f32 %v1672_v15, %v1326_v19  ;;  %v1297_v25 = vmul.f32 %v1676_v0, %v2267_v39  ;;  %v1678_v43 = vpop.eup %1677  ;;  %vm1203_vm5 = vweird.f32 %v1674_v30  ;;  %vm1303_vm6 = vweird.f32 %v1676_v0 }
 0x19c   :  { %v1242_v45 = vmul.f32 %v1238_v56, %v2218_v60  ;;  %v1198_v16 = vmul.f32 %v1674_v30, %v1197_v37  ;;  %v840_v33 = vsub.f32 1.5, %v839_v24  ;;  %v937_v60 = vmul.f32 %v1678_v43, %v2270_v11  ;;  %vm1204_vm8 = vmor %vm1202_vm2, %vm1203_vm5 }
 0x19d   :  { %v1342_v61 = vmul.f32 %v1338_v35, %v2220_v18  ;;  %v1298_v8 = vmul.f32 %v1676_v0, %v1297_v25  ;;  %v1680_v62 = vpop.eup %1679  ;;  %1687 = vrcp.f32 %v953_v42  ;;  %vm1304_vm9 = vmor %vm1302_vm3, %vm1303_vm6  ;;  %vm943_vm10 = vweird.f32 %v1678_v43 }
 0x19e   :  { %1346 = vst [vmem:[%s2366_s2] sm:$0xff] %v1242_v45  ;;  %v1199_v29 = vmul.f32 0.5, %v1198_v16  ;;  %v1140_v57 = vmul.f32 %v1680_v62, %v1664_v27  ;;  %v1144_v52 = vmul.f32 %v1680_v62, %v1666_v50  ;;  %v841_v10 = vmul.f32 %v2274_v20, %v840_v33  ;;  %v1682_v58 = vpop.eup %1681  ;;  %vm944_vm12 = vmor %vm942_vm11, %vm943_vm10 }
 0x19f   :  { %1529 = vst [vmem:[%s2366_s2 + $0x20] sm:$0xff] %v1342_v61  ;;  %v1299_v18 = vmul.f32 0.5, %v1298_v8  ;;  %v938_v31 = vmul.f32 %v1678_v43, %v937_v60  ;;  %v1684_v27 = vpop.eup %1683 }
 0x1a0   :  { %v1200_v23 = vsub.f32 1.5, %v1199_v29  ;;  %v1148_v14 = vmul.f32 %v1140_v57, %v1900_v40  ;;  %v1152_v5 = vmul.f32 %v1144_v52, %v1902_v41  ;;  %v1248_v2 = vmul.f32 %v1140_v57, %v1915_v53  ;;  %v1686_v53 = vpop.eup %1685 }
 0x1a1   :  { %v1300_v63 = vsub.f32 1.5, %v1299_v18  ;;  %v1252_v50 = vmul.f32 %v1144_v52, %v1917_v55  ;;  %v845_v17 = vsel %vm844_vm7, %v2274_v20, %v841_v10  ;;  %v939_v28 = vmul.f32 0.5, %v938_v31 }
 0x1a2   :  { %v1201_v21 = vmul.f32 %v1674_v30, %v1200_v23  ;;  %v2314_v34 = vadd.f32 %v1152_v5, %v1148_v14  ;;  %v849_v41 = vmul.f32 %v845_v17, %v2262_v54 }
 0x1a3   :  { %v1301_v40 = vmul.f32 %v1676_v0, %v1300_v63  ;;  %v2320_v6 = vadd.f32 %v1252_v50, %v1248_v2  ;;  %v940_v55 = vsub.f32 1.5, %v939_v28  ;;  %v1688_v56 = vpop.eup %1687 }
 0x1a4   :  { %v1205_v9 = vsel %vm1204_vm8, %v1674_v30, %v1201_v21  ;;  %v1160_v13 = vmul.f32 %v2314_v34, %v2314_v34  ;;  %v861_v15 = vmul.f32 %v1682_v58, %v849_v41 }
 0x1a5   :  { %v1227_v20 = vmul.f32 %v1205_v9, %v2265_v3  ;;  %v1305_v7 = vsel %vm1304_vm9, %v1676_v0, %v1301_v40  ;;  %v1260_v46 = vmul.f32 %v2320_v6, %v2320_v6  ;;  %v941_v36 = vmul.f32 %v1678_v43, %v940_v55 }
 0x1a6   :  { %v1327_v54 = vmul.f32 %v1305_v7, %v2267_v39  ;;  %v1174_v30 = vrot.slane %v1160_v13, 4  ;;  %v865_v19 = vmul.f32 %v861_v15, %v2230_v32 }
 0x1a7   :  { %v1239_v51 = vmul.f32 %v1684_v27, %v1227_v20  ;;  %v1274_v3 = vrot.slane %v1260_v46, 4  ;;  %v945_v0 = vsel %vm944_vm12, %v1678_v43, %v941_v36 }
 0x1a8   :  { %v1339_v48 = vmul.f32 %v1686_v53, %v1327_v54  ;;  %v1175_v26 = vadd.f32 %v1174_v30, %v1160_v13  ;;  %v949_v39 = vmul.f32 %v945_v0, %v2270_v11  ;;  %v969_v35 = vmul.f32 %v865_v19, %v1860_v1 }
 0x1a9   :  { %v1243_v37 = vmul.f32 %v1239_v51, %v2242_v38  ;;  %v1275_v24 = vadd.f32 %v1274_v3, %v1260_v46  ;;  %v1037_v45 = vmul.f32 %v865_v19, %v1925_v59 }
 0x1aa   :  { %v1343_v25 = vmul.f32 %v1339_v48, %v2244_v12  ;;  %v1176_v32 = vrot.slane %v1175_v26, 2  ;;  %v961_v16 = vmul.f32 %v1688_v56, %v949_v39  ;;  %v988_v43 = vrot.slane %v969_v35, 4 }
 0x1ab   :  { %1347 = vst [vmem:[%s2366_s2 + $0x8] sm:$0xff] %v1243_v37  ;;  %v1276_v38 = vrot.slane %v1275_v24, 2  ;;  %v1056_v11 = vrot.slane %v1037_v45, 4 }
 0x1ac   :  { %1530 = vst [vmem:[%s2366_s2 + $0x28] sm:$0xff] %v1343_v25  ;;  %v1177_v61 = vadd.f32 %v1176_v32, %v1175_v26  ;;  %v965_v8 = vmul.f32 %v961_v16, %v2232_v44  ;;  %v989_v12 = vadd.f32 %v988_v43, %v969_v35 }
 0x1ad   :  { %v1277_v33 = vadd.f32 %v1276_v38, %v1275_v24  ;;  %v1057_v42 = vadd.f32 %v1056_v11, %v1037_v45 }
 0x1ae   :  { %v1178_v62 = vrot.slane %v1177_v61, 1  ;;  %v990_v29 = vrot.slane %v989_v12, 2  ;;  %v997_v60 = vmul.f32 %v965_v8, %v1862_v4  ;;  %v1065_v18 = vmul.f32 %v965_v8, %v1946_v47 }
 0x1af   :  { %v1278_v57 = vrot.slane %v1277_v33, 1  ;;  %v1058_v52 = vrot.slane %v1057_v42, 2 }
 0x1b0   :  { %v1179_v10 = vadd.f32 %v1178_v62, %v1177_v61  ;;  %v1016_v58 = vrot.slane %v997_v60, 4  ;;  %v1084_v23 = vrot.slane %v1065_v18, 4  ;;  %v991_v63 = vadd.f32 %v990_v29, %v989_v12 }
 0x1b1   :  { %v1279_v31 = vadd.f32 %v1278_v57, %v1277_v33  ;;  %v1059_v14 = vadd.f32 %v1058_v52, %v1057_v42 }
 0x1b2   :  { %1689 = vrsqrt.f32 %v1179_v10  ;;  %v1017_v44 = vadd.f32 %v1016_v58, %v997_v60  ;;  %v1085_v5 = vadd.f32 %v1084_v23, %v1065_v18  ;;  %v992_v2 = vrot.slane %v991_v63, 1 }
 0x1b3   :  { %1691 = vrsqrt.f32 %v1279_v31  ;;  %v1060_v21 = vrot.slane %v1059_v14, 1  ;;  %v1232_v54 = vadd.f32 1.0, %v1179_v10  ;;  %v1332_v51 = vadd.f32 1.0, %v1279_v31 }
 0x1b4   :  { %v1018_v27 = vrot.slane %v1017_v44, 2  ;;  %v1086_v50 = vrot.slane %v1085_v5, 2  ;;  %v993_v9 = vadd.f32 %v992_v2, %v991_v63  ;;  %vm1212_vm15 = vweird.f32 %v1179_v10 }
 0x1b5   :  { %v1061_v7 = vadd.f32 %v1060_v21, %v1059_v14  ;;  %1693 = vrcp.f32 %v1232_v54  ;;  %vm1312_vm1 = vweird.f32 %v1279_v31 }
 0x1b6   :  { %v1019_v17 = vadd.f32 %v1018_v27, %v1017_v44  ;;  %v1087_v40 = vadd.f32 %v1086_v50, %v1085_v5  ;;  %1695 = vrcp.f32 %v1332_v51 }
 0x1b8   :  { %v1690_v28 = vpop.eup %1689  ;;  %v1020_v55 = vrot.slane %v1019_v17, 1  ;;  %v1088_v13 = vrot.slane %v1087_v40, 1 }
 0x1b9   :  { %v1692_v41 = vpop.eup %1691  ;;  %v1207_v53 = vmul.f32 %v1690_v28, %v1179_v10  ;;  %vm1213_vm13 = vweird.f32 %v1690_v28 }
 0x1ba   :  { %v1307_v20 = vmul.f32 %v1692_v41, %v1279_v31  ;;  %v1021_v46 = vadd.f32 %v1020_v55, %v1019_v17  ;;  %v1089_v30 = vadd.f32 %v1088_v13, %v1087_v40  ;;  %vm1313_vm14 = vweird.f32 %v1692_v41  ;;  %vm1214_vm0 = vmor %vm1212_vm15, %vm1213_vm13 }
 0x1bb   :  { %v1208_v15 = vmul.f32 %v1690_v28, %v1207_v53  ;;  %vm1314_vm2 = vmor %vm1312_vm1, %vm1313_vm14  ;;  %v1694_v11 = vpop.eup %1693 }
 0x1bc   :  { %v1308_v36 = vmul.f32 %v1692_v41, %v1307_v20  ;;  %v1025_v48 = vadd.f32 %v1021_v46, %v993_v9  ;;  %v1093_v0 = vadd.f32 %v1089_v30, %v1061_v7  ;;  %v1696_v8 = vpop.eup %1695 }
 0x1bd   :  { %v1209_v19 = vmul.f32 0.5, %v1208_v15 }
 0x1be   :  { %v1309_v3 = vmul.f32 0.5, %v1308_v36  ;;  %v1029_v37 = vmul.f32 0.5, %v1025_v48  ;;  %v1097_v39 = vmul.f32 0.5, %v1093_v0 }
 0x1bf   :  { %v1210_v56 = vsub.f32 1.5, %v1209_v19 }
 0x1c0   :  { %v1310_v26 = vsub.f32 1.5, %v1309_v3  ;;  %v1033_v25 = vadd.f32 %v1029_v37, %v2190_v22  ;;  %v1101_v45 = vadd.f32 %v1097_v39, %v2192_v49 }
 0x1c1   :  { %v1211_v35 = vmul.f32 %v1690_v28, %v1210_v56 }
 0x1c2   :  { %v1311_v24 = vmul.f32 %v1692_v41, %v1310_v26  ;;  %v1105_v38 = vmax.f32 %v1033_v25, %v1101_v45 }
 0x1c3   :  { %v1215_v32 = vsel %vm1214_vm0, %v1690_v28, %v1211_v35 }
 0x1c4   :  { %v1228_v16 = vmul.f32 %v1215_v32, %v1179_v10  ;;  %v1315_v43 = vsel %vm1314_vm2, %v1692_v41, %v1311_v24  ;;  %v1109_v33 = vsub.f32 %v1033_v25, %v1105_v38  ;;  %v1121_v42 = vsub.f32 %v1101_v45, %v1105_v38 }
 0x1c5   :  { %v1328_v61 = vmul.f32 %v1315_v43, %v1279_v31 }
 0x1c6   :  { %v1240_v12 = vmul.f32 %v1694_v11, %v1228_v16  ;;  %v1116_v22 = vmul.f32 1.442695, %v1109_v33  ;;  %v1128_v60 = vmul.f32 1.442695, %v1121_v42 }
 0x1c7   :  { %v1340_v62 = vmul.f32 %v1696_v8, %v1328_v61 }
 0x1c8   :  { %v1244_v29 = vmul.f32 %v1240_v12, %v2314_v34  ;;  %1697 = vpow2.f32 %v1116_v22 }
 0x1c9   :  { %v1344_v18 = vmul.f32 %v1340_v62, %v2320_v6  ;;  %1699 = vpow2.f32 %v1128_v60 }
 0x1ca   :  { %1348 = vst [vmem:[%s2366_s2 + $0x10] sm:$0xff] %v1244_v29 }
 0x1cb   :  { %1531 = vst [vmem:[%s2366_s2 + $0x30] sm:$0xff] %v1344_v18 }
 0x1ce   :  { %v1698_v49 = vpop.eup %1697 }
 0x1cf   :  { %v1700_v57 = vpop.eup %1699 }
 0x1d0   :  { %v1133_v52 = vadd.f32 %v1700_v57, %v1698_v49 }
 0x1d2   :  { %1701 = vrcp.f32 %v1133_v52 }
 0x1d8   :  { %v1702_v10 = vpop.eup %1701 }
 0x1d9   :  { %v1141_v34 = vmul.f32 %v1702_v10, %v1698_v49  ;;  %v1145_v58 = vmul.f32 %v1702_v10, %v1700_v57 }
 0x1db   :  { %v1149_v23 = vmul.f32 %v1141_v34, %v1860_v1  ;;  %v1153_v6 = vmul.f32 %v1145_v58, %v1925_v59  ;;  %v1249_v31 = vmul.f32 %v1141_v34, %v1862_v4  ;;  %v1253_v63 = vmul.f32 %v1145_v58, %v1946_v47 }
 0x1dd   :  { %v1157_v14 = vadd.f32 %v1153_v6, %v1149_v23  ;;  %v1257_v44 = vadd.f32 %v1253_v63, %v1249_v31 }
 0x1df   :  { %v1161_v5 = vmul.f32 %v1157_v14, %v1157_v14  ;;  %v1261_v2 = vmul.f32 %v1257_v44, %v1257_v44 }
 0x1e1   :  { %v1180_v27 = vrot.slane %v1161_v5, 4  ;;  %v1280_v21 = vrot.slane %v1261_v2, 4 }
 0x1e3   :  { %v1181_v50 = vadd.f32 %v1180_v27, %v1161_v5  ;;  %v1281_v17 = vadd.f32 %v1280_v21, %v1261_v2 }
 0x1e5   :  { %v1182_v28 = vrot.slane %v1181_v50, 2  ;;  %v1282_v40 = vrot.slane %v1281_v17, 2 }
 0x1e7   :  { %v1183_v41 = vadd.f32 %v1182_v28, %v1181_v50  ;;  %v1283_v53 = vadd.f32 %v1282_v40, %v1281_v17 }
 0x1e9   :  { %v1184_v9 = vrot.slane %v1183_v41, 1  ;;  %v1284_v1 = vrot.slane %v1283_v53, 1 }
 0x1eb   :  { %v1185_v55 = vadd.f32 %v1184_v9, %v1183_v41  ;;  %v1285_v59 = vadd.f32 %v1284_v1, %v1283_v53 }
 0x1ed   :  { %1703 = vrsqrt.f32 %v1185_v55  ;;  %v1233_v15 = vadd.f32 1.0, %v1185_v55  ;;  %v1333_v46 = vadd.f32 1.0, %v1285_v59  ;;  %vm1222_vm5 = vweird.f32 %v1185_v55 }
 0x1ee   :  { %1705 = vrsqrt.f32 %v1285_v59  ;;  %vm1322_vm7 = vweird.f32 %v1285_v59 }
 0x1ef   :  { %1707 = vrcp.f32 %v1233_v15 }
 0x1f0   :  { %1709 = vrcp.f32 %v1333_v46 }
 0x1f3   :  { %v1704_v4 = vpop.eup %1703 }
 0x1f4   :  { %v1706_v47 = vpop.eup %1705  ;;  %v1217_v20 = vmul.f32 %v1704_v4, %v1185_v55  ;;  %vm1223_vm3 = vweird.f32 %v1704_v4 }
 0x1f5   :  { %v1317_v7 = vmul.f32 %v1706_v47, %v1285_v59  ;;  %vm1323_vm4 = vweird.f32 %v1706_v47  ;;  %vm1224_vm6 = vmor %vm1222_vm5, %vm1223_vm3  ;;  %v1708_v26 = vpop.eup %1707 }
 0x1f6   :  { %v1218_v13 = vmul.f32 %v1704_v4, %v1217_v20  ;;  %vm1324_vm8 = vmor %vm1322_vm7, %vm1323_vm4  ;;  %v1710_v35 = vpop.eup %1709 }
 0x1f7   :  { %v1318_v54 = vmul.f32 %v1706_v47, %v1317_v7 }
 0x1f8   :  { %v1219_v36 = vmul.f32 0.5, %v1218_v13 }
 0x1f9   :  { %v1319_v51 = vmul.f32 0.5, %v1318_v54 }
 0x1fa   :  { %v1220_v30 = vsub.f32 1.5, %v1219_v36 }
 0x1fb   :  { %v1320_v19 = vsub.f32 1.5, %v1319_v51 }
 0x1fc   :  { %v1221_v48 = vmul.f32 %v1704_v4, %v1220_v30 }
 0x1fd   :  { %v1321_v3 = vmul.f32 %v1706_v47, %v1320_v19 }
 0x1fe   :  { %v1225_v0 = vsel %vm1224_vm6, %v1704_v4, %v1221_v48 }
 0x1ff   :  { %v1229_v56 = vmul.f32 %v1225_v0, %v1185_v55  ;;  %v1325_v37 = vsel %vm1324_vm8, %v1706_v47, %v1321_v3 }
 0x200   :  { %v1329_v39 = vmul.f32 %v1325_v37, %v1285_v59 }
 0x201   :  { %v1241_v25 = vmul.f32 %v1708_v26, %v1229_v56 }
 0x202   :  { %v1341_v24 = vmul.f32 %v1710_v35, %v1329_v39 }
 0x203   :  { %v1245_v45 = vmul.f32 %v1241_v25, %v1157_v14 }
 0x204   :  { %v1345_v32 = vmul.f32 %v1341_v24, %v1257_v44 }
 0x205   :  { %1349 = vst [vmem:[%s2366_s2 + $0x18] sm:$0xff] %v1245_v45 }
 0x206   :  { %1532 = vst [vmem:[%s2366_s2 + $0x38] sm:$0xff] %v1345_v32 }

</bundles_post_ra>
